<compile_context>
chip_gen: v7x
topology: tpu7x:2x2x1
jax: 0.10.0
libtpu: 0.0.40
codegen_flags: <defaults>
</compile_context>

<pallas_src>
import jax
import jax.numpy as jnp
from jax.experimental import pallas as pl
from jax.experimental.pallas import tpu as pltpu

H = 8          # heads
C_HEAD = 16    # c // h      (fc1 input dim)
T_CAT = 567    # 2*t + t_sup (fc2 input dim)
T_OUT = 243    # t           (fc2 output dim)
T_PAD = 640    # next multiple of 128 >= 567 (matmul K, lane-dense loads)
OUT_PAD = 256  # next multiple of 128 >= 243 (output lanes, unmasked vst)

_SQRT_2_OVER_PI = 0.7978845608028654


def _gelu_tanh(u):
    # tanh-approx GELU: the transcendental goes to the (otherwise idle) EUP slot
    # instead of a long erf polynomial saturating the 4-slot VALU (perf review).
    return 0.5 * u * (1.0 + jnp.tanh(_SQRT_2_OVER_PI * (u + 0.044715 * (u * u * u))))


def attweight_kernel(u_ref, w2t_ref, b2_ref, out_ref):
    # u already contains fc1 + its bias (bf16, lane-padded).  Padded lanes multiply
    # against zero rows of w2t, so whatever GELU produces there contributes nothing.
    a = _gelu_tanh(u_ref[...].astype(jnp.float32))                        # (nb, 640) f32
    v = jnp.dot(a.astype(jnp.bfloat16), w2t_ref[...],                     # bf16 MXU pass
                preferred_element_type=jnp.float32)                       # (nb, 256) f32 acc
    v = v + b2_ref[...]
    out_ref[...] = jax.nn.sigmoid(_gelu_tanh(v))


def _fc1_headmajor(a, w1v, b1s):
    """fc1 (16->1) applied per head, emitted directly in (b, h, j, T) order, bf16."""
    b_, tt, j_, _ = a.shape
    ar = a.reshape(b_, tt, j_, H, C_HEAD).astype(jnp.float32)
    r = jnp.einsum("btjhc,c->bhjt", ar, w1v) + b1s
    return r.astype(jnp.bfloat16)


def att_weight_forward(x, y, z, w1, b1, w2, b2, *, block_rows=512):
    b, t, j, c = x.shape
    t_sup = z.shape[1]
    assert c == H * C_HEAD and 2 * t + t_sup == T_CAT and t == T_OUT
    assert block_rows % 16 == 0  # bf16 sublane tile

    w1v = w1.reshape(C_HEAD).astype(jnp.float32)
    b1s = b1.reshape(()).astype(jnp.float32)

    # ---- fc1 folded into the wrapper, already in output order; lane pad folded into
    #      the concat so no separate transpose / pad pass over the u-sized array ----
    u = jnp.concatenate(
        [_fc1_headmajor(x, w1v, b1s),
         _fc1_headmajor(y, w1v, b1s),
         _fc1_headmajor(z, w1v, b1s),
         jnp.zeros((b, H, j, T_PAD - T_CAT), jnp.bfloat16)],
        axis=-1)                                                          # (b, h, j, 640) bf16

    n = b * H * j
    u = u.reshape(n, T_PAD)

    # Row tile: large (multiple of 256) for MXU occupancy / HBM roofline; shrink only
    # to cover tiny inputs.  No row padding — Pallas masks the ragged last block.
    nb = min(block_rows, max(16, ((n + 15) // 16) * 16))
    grid = (pl.cdiv(n, nb),)

    w2t = jnp.pad(jnp.transpose(w2).astype(jnp.float32),
                  ((0, T_PAD - T_CAT), (0, OUT_PAD - T_OUT))).astype(jnp.bfloat16)  # (640, 256)
    b2p = jnp.pad(b2.reshape(1, T_OUT).astype(jnp.float32),
                  ((0, 0), (0, OUT_PAD - T_OUT)))                                   # (1, 256) f32

    cost = pl.CostEstimate(
        flops=2 * n * T_PAD * OUT_PAD,
        transcendentals=n * (T_PAD + 2 * OUT_PAD),
        bytes_accessed=(n * T_PAD * 2            # u (bf16)
                        + T_PAD * OUT_PAD * 2    # w2t (bf16)
                        + OUT_PAD * 4            # b2 (f32)
                        + n * OUT_PAD * 4),      # out (f32)
    )

    out = pl.pallas_call(
        attweight_kernel,
        out_shape=jax.ShapeDtypeStruct((n, OUT_PAD), jnp.float32),
        grid_spec=pltpu.PrefetchScalarGridSpec(
            num_scalar_prefetch=0,
            grid=grid,
            in_specs=[
                pl.BlockSpec((nb, T_PAD), lambda i: (i, 0)),        # fc1 output rows (bf16)
                pl.BlockSpec((T_PAD, OUT_PAD), lambda i: (0, 0)),   # fc2 weight^T (bf16)
                pl.BlockSpec((1, OUT_PAD), lambda i: (0, 0)),       # fc2 bias (f32)
            ],
            out_specs=pl.BlockSpec((nb, OUT_PAD), lambda i: (i, 0)),
        ),
        compiler_params=pltpu.CompilerParams(
            dimension_semantics=("parallel",)),
        cost_estimate=cost,
    )(u, w2t, b2p)

    # Strip lane padding; (n, 243) -> (b, h, j, t, 1) (matches the torch output shape).
    return out[:, :T_OUT].reshape(b, H, j, t, 1)


def reference(x, y, z, w1, b1, w2, b2):
    """Pure-JAX replica of the PyTorch forward (exact-erf GELU, f32) for checking."""
    b, t, j, c = x.shape
    t_sup = z.shape[1]
    xr = x.reshape(b, t, j, H, -1)
    yr = y.reshape(b, t, j, H, -1)
    zr = z.reshape(b, t_sup, j, H, -1)
    s = jnp.concatenate([xr, yr, zr], axis=1).transpose(0, 3, 2, 1, 4)
    s = s @ w1.T + b1                                   # fc1
    s = jax.nn.gelu(s, approximate=False)
    s = s.reshape(b, H, j, -1)
    s = s @ w2.T + b2                                   # fc2
    s = jax.nn.gelu(s, approximate=False)
    s = s.reshape(b, H, j, t, 1)
    return jax.nn.sigmoid(s)


if __name__ == "__main__":
    key = jax.random.PRNGKey(0)
    kx, ky, kz, kw1, kb1, kw2, kb2 = jax.random.split(key, 7)

    # fc1/fc2 dims force t=243, t_sup=81, c=128; keep batch and joints small.
    b, t, t_sup, j, c = 2, 243, 81, 4, 128
    x = jax.random.normal(kx, (b, t, j, c), jnp.float32)
    y = jax.random.normal(ky, (b, t, j, c), jnp.float32)
    z = jax.random.normal(kz, (b, t_sup, j, c), jnp.float32)

    # Deterministic synthetic parameters (shapes from nn.Linear(16,1), nn.Linear(567,243)).
    w1 = jax.random.normal(kw1, (1, C_HEAD), jnp.float32) * 0.25
    b1 = jax.random.normal(kb1, (1,), jnp.float32) * 0.1
    w2 = jax.random.normal(kw2, (T_OUT, T_CAT), jnp.float32) * 0.05
    b2 = jax.random.normal(kb2, (T_OUT,), jnp.float32) * 0.1

    out = jax.block_until_ready(att_weight_forward(x, y, z, w1, b1, w2, b2))
    ref = reference(x, y, z, w1, b1, w2, b2)

    assert out.shape == (b, H, j, t, 1), out.shape
    # bf16 streaming / bf16 MXU operands / tanh-approx GELU give ~1e-3-level agreement
    # with the exact erf/f32 reference; output is post-sigmoid so errors are bounded.
    max_err = float(jnp.max(jnp.abs(out - ref)))
    assert max_err < 2e-2, max_err
    print("KERNEL_OK")
</pallas_src>

<mosaic_0001>
module attributes {stable_mosaic.version = 11 : i64} {
  func.func @attweight_kernel(%arg0: i32, %arg1: memref<64x640xbf16, #tpu.memory_space<vmem>>, %arg2: memref<640x256xbf16, #tpu.memory_space<vmem>>, %arg3: memref<1x256xf32, #tpu.memory_space<vmem>>, %arg4: memref<64x256xf32, #tpu.memory_space<vmem>>) attributes {dimension_semantics = [#tpu.dimension_semantics<parallel>], iteration_bounds = array<i64: 1>, scalar_prefetch = 0 : i64, scratch_operands = 0 : i64, tpu.core_type = #tpu.core_type<tc>, window_params = [{transform_indices = @transform_0, window_bounds = array<i64: 64, 640>}, {pipeline_mode = #tpu.pipeline_mode<synchronous>, transform_indices = @transform_1, window_bounds = array<i64: 640, 256>}, {pipeline_mode = #tpu.pipeline_mode<synchronous>, transform_indices = @transform_2, window_bounds = array<i64: 1, 256>}, {transform_indices = @transform_3, window_bounds = array<i64: 64, 256>}]} {
    %c0 = arith.constant 0 : index
    %c0_0 = arith.constant 0 : index
    %0 = vector.load %arg1[%c0, %c0_0] : memref<64x640xbf16, #tpu.memory_space<vmem>>, vector<64x640xbf16>
    %1 = arith.extf %0 : vector<64x640xbf16> to vector<64x640xf32>
    %cst = arith.constant 5.000000e-01 : f32
    %2 = vector.broadcast %cst : f32 to vector<64x640xf32>
    %3 = arith.mulf %2, %1 : vector<64x640xf32>
    %4 = arith.mulf %1, %1 : vector<64x640xf32>
    %5 = arith.mulf %4, %1 : vector<64x640xf32>
    %cst_1 = arith.constant 4.471500e-02 : f32
    %6 = vector.broadcast %cst_1 : f32 to vector<64x640xf32>
    %7 = arith.mulf %6, %5 : vector<64x640xf32>
    %8 = arith.addf %1, %7 : vector<64x640xf32>
    %cst_2 = arith.constant 0.797884583 : f32
    %9 = vector.broadcast %cst_2 : f32 to vector<64x640xf32>
    %10 = arith.mulf %9, %8 : vector<64x640xf32>
    %11 = math.tanh %10 : vector<64x640xf32>
    %cst_3 = arith.constant 1.000000e+00 : f32
    %12 = vector.broadcast %cst_3 : f32 to vector<64x640xf32>
    %13 = arith.addf %12, %11 : vector<64x640xf32>
    %14 = arith.mulf %3, %13 : vector<64x640xf32>
    %15 = arith.truncf %14 : vector<64x640xf32> to vector<64x640xbf16>
    %c0_4 = arith.constant 0 : index
    %c0_5 = arith.constant 0 : index
    %16 = vector.load %arg2[%c0_4, %c0_5] : memref<640x256xbf16, #tpu.memory_space<vmem>>, vector<640x256xbf16>
    %cst_6 = arith.constant dense<0.000000e+00> : vector<64x256xf32>
    %17 = tpu.matmul %15, %16, %cst_6 {dimension_numbers = #tpu.dot_dimension_numbers<[1], [0], [0], [1], [0, 0, 1, 1], [], []>} : vector<64x640xbf16>, vector<640x256xbf16>, vector<64x256xf32> -> vector<64x256xf32>
    %c0_7 = arith.constant 0 : index
    %c0_8 = arith.constant 0 : index
    %18 = vector.load %arg3[%c0_7, %c0_8] : memref<1x256xf32, #tpu.memory_space<vmem>>, vector<1x256xf32>
    %19 = vector.broadcast %18 : vector<1x256xf32> to vector<64x256xf32>
    %20 = arith.addf %17, %19 : vector<64x256xf32>
    %cst_9 = arith.constant 5.000000e-01 : f32
    %21 = vector.broadcast %cst_9 : f32 to vector<64x256xf32>
    %22 = arith.mulf %21, %20 : vector<64x256xf32>
    %23 = arith.mulf %20, %20 : vector<64x256xf32>
    %24 = arith.mulf %23, %20 : vector<64x256xf32>
    %cst_10 = arith.constant 4.471500e-02 : f32
    %25 = vector.broadcast %cst_10 : f32 to vector<64x256xf32>
    %26 = arith.mulf %25, %24 : vector<64x256xf32>
    %27 = arith.addf %20, %26 : vector<64x256xf32>
    %cst_11 = arith.constant 0.797884583 : f32
    %28 = vector.broadcast %cst_11 : f32 to vector<64x256xf32>
    %29 = arith.mulf %28, %27 : vector<64x256xf32>
    %30 = math.tanh %29 : vector<64x256xf32>
    %cst_12 = arith.constant 1.000000e+00 : f32
    %31 = vector.broadcast %cst_12 : f32 to vector<64x256xf32>
    %32 = arith.addf %31, %30 : vector<64x256xf32>
    %33 = arith.mulf %22, %32 : vector<64x256xf32>
    %34 = arith.negf %33 : vector<64x256xf32>
    %35 = math.exp %34 : vector<64x256xf32>
    %cst_13 = arith.constant 1.000000e+00 : f32
    %36 = vector.broadcast %cst_13 : f32 to vector<64x256xf32>
    %37 = arith.addf %36, %35 : vector<64x256xf32>
    %38 = arith.divf %36, %37 : vector<64x256xf32>
    %c0_14 = arith.constant 0 : index
    %c0_15 = arith.constant 0 : index
    %39 = vector.load %arg4[%c0_14, %c0_15] : memref<64x256xf32, #tpu.memory_space<vmem>>, vector<64x256xf32>
    tpu.vector_store %arg4[%c0_14, %c0_15], %38 {strides = array<i32>} : memref<64x256xf32, #tpu.memory_space<vmem>>, vector<64x256xf32>,
    return
  }
  func.func @transform_0(%arg0: i32) -> (i32, i32) {
    %c0_i32 = arith.constant 0 : i32
    %c0_i32_0 = arith.constant 0 : i32
    return %arg0, %c0_i32 : i32, i32
  }
  func.func @transform_1(%arg0: i32) -> (i32, i32) {
    %c0_i32 = arith.constant 0 : i32
    %c0_i32_0 = arith.constant 0 : i32
    %c0_i32_1 = arith.constant 0 : i32
    return %c0_i32, %c0_i32_0 : i32, i32
  }
  func.func @transform_2(%arg0: i32) -> (i32, i32) {
    %c0_i32 = arith.constant 0 : i32
    %c0_i32_0 = arith.constant 0 : i32
    %c0_i32_1 = arith.constant 0 : i32
    return %c0_i32, %c0_i32_0 : i32, i32
  }
  func.func @transform_3(%arg0: i32) -> (i32, i32) {
    %c0_i32 = arith.constant 0 : i32
    %c0_i32_0 = arith.constant 0 : i32
    return %arg0, %c0_i32 : i32, i32
  }
}

</mosaic_0001>

<bundles_post_ra>
// kernel: tpu_custom_call.1
= control target key start
LH: loop header
LB: loop body
LE: loop exit
PB: predicated region body
PF: predicated region fallthrough
CT: control target
= control target key end

     0   :  { %8 = vsyncpa [#allocation3], 0  ;;  %s2552_s0 = inlined_call_operand.hbm [shape: bf16[64,640], index: 0, kind: input, shape index: {}]   ;;  %s2553_s1 = inlined_call_operand.hbm [shape: bf16[640,256], index: 1, kind: input, shape index: {}]   ;;  %s2554_s2 = inlined_call_operand.vmem [shape: f32[1,256], index: 2, kind: input, shape index: {}]   ;;  %s2555_s3 = inlined_call_operand.hbm [shape: f32[64,256], index: 3, kind: output, shape index: {}]  }
   0x1   :  { %9 = vsyncpa [#allocation6], 0 }
   0x2   :  { %10 = vsyncpa [#allocation4], 0  ;;  %s2011_s12 = smov [#allocation2]   ;;  %s1939_s16 = scalar_lea.hbm %s2552_s0, 2560 }
   0x3   :  { %s16_s13 = sshll.u32 %s2011_s12, 4  ;;  %p1940_p0 = scmp.ne.s32.totalorder %s2552_s0, %s1939_s16  ;;  %s17_s13 = int_to_ptr.vmem [resolvable:$true] %s16_s13 }
   0x4   :  { %p1943_p1 = scmp.lt.u32.totalorder %s1939_s16, %s2552_s0 }
   0x6   :  { %p1945_p2 = pnand %p1943_p1, %p1940_p0 }
   0x8   :  { %1948 = shalt.err (!%p1945_p2)
}
   0x9   :  { %s1949_s21 = scalar_lea.vmem %s17_s13, 2560  ;;  %p1954_p4 = scmp.lt.s32.totalorder %s17_s13, %s17_s13 }
   0xa   :  { %p1950_p3 = scmp.ne.s32.totalorder %s17_s13, %s1949_s21  ;;  %p1955_p5 = scmp.lt.s32.totalorder %s1949_s21, %s1949_s21 }
   0xc   :  { %p1956_p6 = por %p1955_p5, %p1954_p4 }
   0xe   :  { %p1957_p7 = pnand %p1956_p6, %p1950_p3 }
  0x10   :  { %1960 = shalt.err (!%p1957_p7)
}
  0x11   :  { %s2012_s22 = smov 320   ;;  %s2013_s23 = smov 20  }
  0x12   :  { %22 = dma.hbm_to_vmem [thread:$0]  %s2552_s0, 2560, %s17_s13, [#allocation3], %s2012_s22, %s2012_s22, %s2013_s23  }
  0x13   :  { %s2014_s26 = smov [#allocation5]   ;;  %s1961_s30 = scalar_lea.hbm %s2553_s1, 10240 }
  0x14   :  { %s28_s27 = sshll.u32 %s2014_s26, 4  ;;  %p1962_p8 = scmp.ne.s32.totalorder %s2553_s1, %s1961_s30  ;;  %s29_s27 = int_to_ptr.vmem [resolvable:$true] %s28_s27 }
  0x15   :  { %p1965_p9 = scmp.lt.u32.totalorder %s1961_s30, %s2553_s1 }
  0x17   :  { %p1967_p10 = pnand %p1965_p9, %p1962_p8 }
  0x19   :  { %1970 = shalt.err (!%p1967_p10)
}
  0x1a   :  { %s1971_s8 = scalar_lea.vmem %s29_s27, 10240  ;;  %p1976_p12 = scmp.lt.s32.totalorder %s29_s27, %s29_s27 }
  0x1b   :  { %p1972_p11 = scmp.ne.s32.totalorder %s29_s27, %s1971_s8  ;;  %p1977_p13 = scmp.lt.s32.totalorder %s1971_s8, %s1971_s8 }
  0x1d   :  { %p1978_p0 = por %p1977_p13, %p1976_p12 }
  0x1f   :  { %p1979_p1 = pnand %p1978_p0, %p1972_p11 }
  0x21   :  { %1982 = shalt.err (!%p1979_p1)
}
  0x22   :  { %s2015_s0 = smov 128   ;;  %s2016_s9 = smov 8  }
  0x23   :  { %34 = dma.hbm_to_vmem [thread:$0]  %s2553_s1, 10240, %s29_s27, [#allocation6], %s2015_s0, %s2015_s0, %s2016_s9  }
  0x24   :  { %2005 = dma.done.wait [#allocation3], 2560  }
  0x25   :  { %2006 = vsyncadd [#allocation3], 4294964736 }
  0x26   :  { %2007 = dma.done.wait [#allocation6], 10240  }
  0x27   :  { %2008 = vsyncadd [#allocation6], 4294957056  ;;  %v1643_v0 = vld [vmem:[#allocation5 + $0x4] ss:$8 sps:$4 sm:$0xff]   ;;  %v1647_v2 = vld [vmem:[#allocation5] ss:$8 sps:$4 sm:$0xff]  }
  0x28   :  { %v1645_v1 = vld [vmem:[#allocation5 + $0x104] ss:$8 sps:$4 sm:$0xff]   ;;  %980 = vmatprep.subr.bf16.mxu1 %v1643_v0  ;;  %v1648_v3 = vld [vmem:[#allocation5 + $0x100] ss:$8 sps:$4 sm:$0xff]   ;;  %v1649_v4 = vld [vmem:[#allocation5 + $0x14] ss:$8 sps:$4 sm:$0xff]  }
  0x29   :  { %1053 = vmatprep.subr.bf16.mxu0 %v1645_v1  ;;  %981 = vmatpush1.bf16.msra.mxu1 %v1647_v2  ;;  %v1651_v5 = vld [vmem:[#allocation5 + $0x114] ss:$8 sps:$4 sm:$0xff]   ;;  %v1653_v6 = vld [vmem:[#allocation5 + $0x10] ss:$8 sps:$4 sm:$0xff]   ;;  %v1655_v8 = vld [vmem:[#allocation5 + $0x24] ss:$8 sps:$4 sm:$0xff]  }
  0x2a   :  { %1054 = vmatpush1.bf16.msra.mxu0 %v1648_v3  ;;  %982 = vmatprep.subr.bf16.mxu1 %v1649_v4  ;;  %v1654_v7 = vld [vmem:[#allocation5 + $0x110] ss:$8 sps:$4 sm:$0xff]   ;;  %v1657_v9 = vld [vmem:[#allocation5 + $0x124] ss:$8 sps:$4 sm:$0xff]   ;;  %v1659_v10 = vld [vmem:[#allocation5 + $0x20] ss:$8 sps:$4 sm:$0xff]  }
  0x2b   :  { %1055 = vmatprep.subr.bf16.mxu0 %v1651_v5  ;;  %v1660_v11 = vld [vmem:[#allocation5 + $0x120] ss:$8 sps:$4 sm:$0xff]   ;;  %v1661_v12 = vld [vmem:[#allocation5 + $0x34] ss:$8 sps:$4 sm:$0xff]   ;;  %v1665_v14 = vld [vmem:[#allocation5 + $0x30] ss:$8 sps:$4 sm:$0xff]  }
  0x2c   :  { %v1663_v13 = vld [vmem:[#allocation5 + $0x134] ss:$8 sps:$4 sm:$0xff]   ;;  %v1666_v15 = vld [vmem:[#allocation5 + $0x130] ss:$8 sps:$4 sm:$0xff]   ;;  %v1667_v16 = vld [vmem:[#allocation5 + $0x44] ss:$8 sps:$4 sm:$0xff]  }
  0x2d   :  { %983 = vmatpush1.bf16.msra.mxu1 %v1653_v6  ;;  %v1669_v17 = vld [vmem:[#allocation5 + $0x144] ss:$8 sps:$4 sm:$0xff]   ;;  %v1671_v18 = vld [vmem:[#allocation5 + $0x40] ss:$8 sps:$4 sm:$0xff]   ;;  %v1673_v20 = vld [vmem:[#allocation5 + $0x54] ss:$8 sps:$4 sm:$0xff]  }
  0x2e   :  { %1056 = vmatpush1.bf16.msra.mxu0 %v1654_v7  ;;  %984 = vmatprep.subr.bf16.mxu1 %v1655_v8  ;;  %v1672_v19 = vld [vmem:[#allocation5 + $0x140] ss:$8 sps:$4 sm:$0xff]   ;;  %v1675_v21 = vld [vmem:[#allocation5 + $0x154] ss:$8 sps:$4 sm:$0xff]   ;;  %v1677_v22 = vld [vmem:[#allocation5 + $0x50] ss:$8 sps:$4 sm:$0xff]  }
  0x2f   :  { %1057 = vmatprep.subr.bf16.mxu0 %v1657_v9  ;;  %v1678_v23 = vld [vmem:[#allocation5 + $0x150] ss:$8 sps:$4 sm:$0xff]   ;;  %v1679_v24 = vld [vmem:[#allocation5 + $0x64] ss:$8 sps:$4 sm:$0xff]   ;;  %v1683_v26 = vld [vmem:[#allocation5 + $0x60] ss:$8 sps:$4 sm:$0xff]  }
  0x30   :  { %v1681_v25 = vld [vmem:[#allocation5 + $0x164] ss:$8 sps:$4 sm:$0xff]   ;;  %v1684_v27 = vld [vmem:[#allocation5 + $0x160] ss:$8 sps:$4 sm:$0xff]   ;;  %v1685_v28 = vld [vmem:[#allocation5 + $0x74] ss:$8 sps:$4 sm:$0xff]  }
  0x31   :  { %985 = vmatpush1.bf16.msra.mxu1 %v1659_v10  ;;  %v1687_v29 = vld [vmem:[#allocation5 + $0x174] ss:$8 sps:$4 sm:$0xff]   ;;  %v1689_v30 = vld [vmem:[#allocation5 + $0x70] ss:$8 sps:$4 sm:$0xff]   ;;  %v1691_v32 = vld [vmem:[#allocation5 + $0x84] ss:$8 sps:$4 sm:$0xff]  }
  0x32   :  { %1058 = vmatpush1.bf16.msra.mxu0 %v1660_v11  ;;  %986 = vmatprep.subr.bf16.mxu1 %v1661_v12  ;;  %v1690_v31 = vld [vmem:[#allocation5 + $0x170] ss:$8 sps:$4 sm:$0xff]   ;;  %v1693_v33 = vld [vmem:[#allocation5 + $0x184] ss:$8 sps:$4 sm:$0xff]   ;;  %v1695_v34 = vld [vmem:[#allocation5 + $0x80] ss:$8 sps:$4 sm:$0xff]  }
  0x33   :  { %1059 = vmatprep.subr.bf16.mxu0 %v1663_v13  ;;  %v1696_v35 = vld [vmem:[#allocation5 + $0x180] ss:$8 sps:$4 sm:$0xff]   ;;  %v1697_v36 = vld [vmem:[#allocation5 + $0x94] ss:$8 sps:$4 sm:$0xff]   ;;  %v1701_v38 = vld [vmem:[#allocation5 + $0x90] ss:$8 sps:$4 sm:$0xff]  }
  0x34   :  { %v1699_v37 = vld [vmem:[#allocation5 + $0x194] ss:$8 sps:$4 sm:$0xff]   ;;  %v1702_v39 = vld [vmem:[#allocation5 + $0x190] ss:$8 sps:$4 sm:$0xff]   ;;  %v1703_v40 = vld [vmem:[#allocation5 + $0xa4] ss:$8 sps:$4 sm:$0xff]  }
  0x35   :  { %987 = vmatpush1.bf16.msra.mxu1 %v1665_v14  ;;  %v1705_v41 = vld [vmem:[#allocation5 + $0x1a4] ss:$8 sps:$4 sm:$0xff]   ;;  %v1707_v42 = vld [vmem:[#allocation5 + $0xa0] ss:$8 sps:$4 sm:$0xff]   ;;  %v1709_v44 = vld [vmem:[#allocation5 + $0xb4] ss:$8 sps:$4 sm:$0xff]  }
  0x36   :  { %1060 = vmatpush1.bf16.msra.mxu0 %v1666_v15  ;;  %988 = vmatprep.subr.bf16.mxu1 %v1667_v16  ;;  %v1708_v43 = vld [vmem:[#allocation5 + $0x1a0] ss:$8 sps:$4 sm:$0xff]   ;;  %v1711_v45 = vld [vmem:[#allocation5 + $0x1b4] ss:$8 sps:$4 sm:$0xff]   ;;  %v1713_v46 = vld [vmem:[#allocation5 + $0xb0] ss:$8 sps:$4 sm:$0xff]  }
  0x37   :  { %1061 = vmatprep.subr.bf16.mxu0 %v1669_v17  ;;  %v1714_v47 = vld [vmem:[#allocation5 + $0x1b0] ss:$8 sps:$4 sm:$0xff]   ;;  %v44_v48 = vld [vmem:[#allocation2] sm:$0xff]  ;;  %v45_v51 = vld [vmem:[#allocation2 + $0x8] sm:$0xff] }
  0x38   :  { %v47_v49 = vld [vmem:[#allocation2 + $0x14] sm:$0xff]  ;;  %v69_v50 = vunpack.c.h.bf16 %v44_v48  ;;  %v48_v52 = vld [vmem:[#allocation2 + $0x1c] sm:$0xff]  ;;  %v1715_v53 = vld [vmem:[#allocation5 + $0xc4] ss:$8 sps:$4 sm:$0xff]   ;;  %v2065_v54 = vunpack.c.l.bf16 %v44_v48  ;;  %v2067_v56 = vunpack.c.h.bf16 %v45_v51  ;;  %v2075_v2 = vunpack.c.l.bf16 %v45_v51 }
  0x39   :  { %989 = vmatpush1.bf16.msra.mxu1 %v1671_v18  ;;  %v74_v55 = vunpack.c.h.bf16 %v47_v49  ;;  %v1717_v57 = vld [vmem:[#allocation5 + $0x1c4] ss:$8 sps:$4 sm:$0xff]   ;;  %v2069_v58 = vunpack.c.l.bf16 %v47_v49  ;;  %v2071_v60 = vunpack.c.h.bf16 %v48_v52  ;;  %v1719_v63 = vld [vmem:[#allocation5 + $0xc0] ss:$8 sps:$4 sm:$0xff]   ;;  %v1721_v4 = vld [vmem:[#allocation5 + $0xd4] ss:$8 sps:$4 sm:$0xff]   ;;  %v2079_v6 = vunpack.c.l.bf16 %v48_v52 }
  0x3a   :  { %1062 = vmatpush1.bf16.msra.mxu0 %v1672_v19  ;;  %990 = vmatprep.subr.bf16.mxu1 %v1673_v20  ;;  %v149_v59 = vmul.f32 %v69_v50, %v69_v50  ;;  %v151_v62 = vmul.f32 %v2067_v56, %v2067_v56  ;;  %v1720_v0 = vld [vmem:[#allocation5 + $0x1c0] ss:$8 sps:$4 sm:$0xff]   ;;  %v148_v8 = vmul.f32 %v2065_v54, %v2065_v54  ;;  %v1723_v9 = vld [vmem:[#allocation5 + $0x1d4] ss:$8 sps:$4 sm:$0xff]   ;;  %v2084_v10 = vmul.f32 0.5, %v69_v50 }
  0x3b   :  { %1063 = vmatprep.subr.bf16.mxu0 %v1675_v21  ;;  %v154_v61 = vmul.f32 %v74_v55, %v74_v55  ;;  %v156_v3 = vmul.f32 %v2071_v60, %v2071_v60  ;;  %v153_v13 = vmul.f32 %v2069_v58, %v2069_v58  ;;  %v2089_v14 = vmul.f32 0.5, %v74_v55  ;;  %v1725_v18 = vld [vmem:[#allocation5 + $0xd0] ss:$8 sps:$4 sm:$0xff]  }
  0x3c   :  { %v189_v1 = vmul.f32 %v149_v59, %v69_v50  ;;  %v191_v7 = vmul.f32 %v151_v62, %v2067_v56  ;;  %v188_v17 = vmul.f32 %v148_v8, %v2065_v54  ;;  %v1726_v19 = vld [vmem:[#allocation5 + $0x1d0] ss:$8 sps:$4 sm:$0xff]  }
  0x3d   :  { %991 = vmatpush1.bf16.msra.mxu1 %v1677_v22  ;;  %v194_v5 = vmul.f32 %v154_v61, %v74_v55  ;;  %v196_v12 = vmul.f32 %v156_v3, %v2071_v60  ;;  %v193_v22 = vmul.f32 %v153_v13, %v2069_v58  ;;  %v2116_v61 = vld [vmem:[#allocation2 + $0x44] sm:$0xff]  ;;  %v1737_v62 = vld [vmem:[#allocation5 + $0xf0] ss:$8 sps:$4 sm:$0xff]  }
  0x3e   :  { %1064 = vmatpush1.bf16.msra.mxu0 %v1678_v23  ;;  %992 = vmatprep.subr.bf16.mxu1 %v1679_v24  ;;  %v229_v11 = vmul.f32 0.044715, %v189_v1  ;;  %v231_v16 = vmul.f32 0.044715, %v191_v7  ;;  %v150_v23 = vmul.f32 %v2075_v2, %v2075_v2  ;;  %v1727_v24 = vld [vmem:[#allocation5 + $0xe4] ss:$8 sps:$4 sm:$0xff]   ;;  %v2129_v8 = vunpack.c.h.bf16 %v2116_v61 }
  0x3f   :  { %1065 = vmatprep.subr.bf16.mxu0 %v1681_v25  ;;  %v234_v15 = vmul.f32 0.044715, %v194_v5  ;;  %v236_v21 = vmul.f32 0.044715, %v196_v12  ;;  %v1729_v25 = vld [vmem:[#allocation5 + $0x1e4] ss:$8 sps:$4 sm:$0xff]  }
  0x40   :  { %v269_v20 = vadd.f32 %v229_v11, %v69_v50  ;;  %v108_v11 = vmul.f32 0.5, %v2065_v54 }
  0x41   :  { %993 = vmatpush1.bf16.msra.mxu1 %v1683_v26  ;;  %v274_v26 = vadd.f32 %v234_v15, %v74_v55  ;;  %v2111_v55 = vmul.f32 0.5, %v2067_v56  ;;  %v113_v15 = vmul.f32 0.5, %v2069_v58 }
  0x42   :  { %1066 = vmatpush1.bf16.msra.mxu0 %v1684_v27  ;;  %994 = vmatprep.subr.bf16.mxu1 %v1685_v28  ;;  %v271_v27 = vadd.f32 %v231_v16, %v2067_v56  ;;  %v228_v28 = vmul.f32 0.044715, %v188_v17  ;;  %v1738_v56 = vld [vmem:[#allocation5 + $0x1f0] ss:$8 sps:$4 sm:$0xff]   ;;  %v166_v17 = vmul.f32 %v2129_v8, %v2129_v8 }
  0x43   :  { %1067 = vmatprep.subr.bf16.mxu0 %v1687_v29  ;;  %v155_v29 = vmul.f32 %v2079_v6, %v2079_v6 }
  0x45   :  { %995 = vmatpush1.bf16.msra.mxu1 %v1689_v30  ;;  %v309_v30 = vmul.f32 0.7978846, %v269_v20 }
  0x46   :  { %1068 = vmatpush1.bf16.msra.mxu0 %v1690_v31  ;;  %996 = vmatprep.subr.bf16.mxu1 %v1691_v32  ;;  %v276_v31 = vadd.f32 %v236_v21, %v2071_v60  ;;  %v233_v32 = vmul.f32 0.044715, %v193_v22 }
  0x47   :  { %1069 = vmatprep.subr.bf16.mxu0 %v1693_v33  ;;  %v190_v33 = vmul.f32 %v150_v23, %v2075_v2  ;;  %1763 = vtanh.f32 %v309_v30 }
  0x49   :  { %997 = vmatpush1.bf16.msra.mxu1 %v1695_v34  ;;  %v50_v34 = vld [vmem:[#allocation2 + $0x28] sm:$0xff] }
  0x4a   :  { %1070 = vmatpush1.bf16.msra.mxu0 %v1696_v35  ;;  %998 = vmatprep.subr.bf16.mxu1 %v1697_v36  ;;  %v53_v35 = vld [vmem:[#allocation2 + $0x3c] sm:$0xff]  ;;  %v2103_v49 = vunpack.c.h.bf16 %v50_v34 }
  0x4b   :  { %1071 = vmatprep.subr.bf16.mxu0 %v1699_v37  ;;  %v1731_v36 = vld [vmem:[#allocation5 + $0xe0] ss:$8 sps:$4 sm:$0xff]   ;;  %v2106_v52 = vunpack.c.h.bf16 %v53_v35 }
  0x4c   :  { %v1732_v37 = vld [vmem:[#allocation5 + $0x1e0] ss:$8 sps:$4 sm:$0xff]   ;;  %v159_v59 = vmul.f32 %v2103_v49, %v2103_v49 }
  0x4d   :  { %999 = vmatpush1.bf16.msra.mxu1 %v1701_v38  ;;  %v314_v38 = vmul.f32 0.7978846, %v274_v26  ;;  %v164_v1 = vmul.f32 %v2106_v52, %v2106_v52 }
  0x4e   :  { %1072 = vmatpush1.bf16.msra.mxu0 %v1702_v39  ;;  %1000 = vmatprep.subr.bf16.mxu1 %v1703_v40  ;;  %v311_v39 = vmul.f32 0.7978846, %v271_v27  ;;  %v268_v40 = vadd.f32 %v228_v28, %v2065_v54 }
  0x4f   :  { %1073 = vmatprep.subr.bf16.mxu0 %v1705_v41  ;;  %v195_v41 = vmul.f32 %v155_v29, %v2079_v6  ;;  %1765 = vtanh.f32 %v314_v38  ;;  %v204_v7 = vmul.f32 %v164_v1, %v2106_v52 }
  0x50   :  { %1767 = vtanh.f32 %v311_v39 }
  0x51   :  { %1001 = vmatpush1.bf16.msra.mxu1 %v1707_v42  ;;  %v1733_v42 = vld [vmem:[#allocation5 + $0xf4] ss:$8 sps:$4 sm:$0xff]   ;;  %v235_v48 = vmul.f32 0.044715, %v195_v41  ;;  %v244_v16 = vmul.f32 0.044715, %v204_v7  ;;  %v1764_v22 = vpop.eup %1763 }
  0x52   :  { %1074 = vmatpush1.bf16.msra.mxu0 %v1708_v43  ;;  %1002 = vmatprep.subr.bf16.mxu1 %v1709_v44  ;;  %v316_v43 = vmul.f32 0.7978846, %v276_v31  ;;  %v273_v44 = vadd.f32 %v233_v32, %v2069_v58  ;;  %v115_v58 = vmul.f32 0.5, %v2079_v6  ;;  %v389_v26 = vadd.f32 1.0, %v1764_v22 }
  0x53   :  { %1075 = vmatprep.subr.bf16.mxu0 %v1711_v45  ;;  %v230_v45 = vmul.f32 0.044715, %v190_v33  ;;  %v284_v23 = vadd.f32 %v244_v16, %v2106_v52  ;;  %v1744_v16 = vld [vmem:[#allocation5 + $0x214] ss:$8 sps:$4 sm:$0xff]   ;;  %v124_v22 = vmul.f32 0.5, %v2106_v52  ;;  %v2189_v52 = vld [vmem:[#allocation2 + $0x6c] sm:$0xff] }
  0x54   :  { %v313_v50 = vmul.f32 0.7978846, %v273_v44  ;;  %1769 = vtanh.f32 %v316_v43 }
  0x55   :  { %1003 = vmatpush1.bf16.msra.mxu1 %v1713_v46  ;;  %v1735_v46 = vld [vmem:[#allocation5 + $0x1f4] ss:$8 sps:$4 sm:$0xff]   ;;  %v270_v51 = vadd.f32 %v230_v45, %v2075_v2  ;;  %v324_v32 = vmul.f32 0.7978846, %v284_v23 }
  0x56   :  { %1076 = vmatpush1.bf16.msra.mxu0 %v1714_v47  ;;  %1004 = vmatprep.subr.bf16.mxu1 %v1715_v53  ;;  %v308_v47 = vmul.f32 0.7978846, %v268_v40  ;;  %v2108_v53 = vld [vmem:[#allocation2 + $0x30] sm:$0xff] }
  0x57   :  { %1077 = vmatprep.subr.bf16.mxu0 %v1717_v57  ;;  %v275_v57 = vadd.f32 %v235_v48, %v2079_v6  ;;  %v2125_v5 = vunpack.c.h.bf16 %v2108_v53  ;;  %v2164_v7 = vunpack.c.l.bf16 %v2108_v53 }
  0x58   :  { %1771 = vtanh.f32 %v308_v47 }
  0x59   :  { %1005 = vmatpush1.bf16.msra.mxu1 %v1719_v63  ;;  %v2119_v63 = vmul.f32 0.5, %v2071_v60  ;;  %1773 = vtanh.f32 %v313_v50  ;;  %v315_v3 = vmul.f32 0.7978846, %v275_v57  ;;  %v1741_v60 = vld [vmem:[#allocation5 + $0x204] ss:$8 sps:$4 sm:$0xff]   ;;  %v161_v13 = vmul.f32 %v2125_v5, %v2125_v5 }
  0x5a   :  { %1078 = vmatpush1.bf16.msra.mxu0 %v1720_v0  ;;  %1006 = vmatprep.subr.bf16.mxu1 %v1721_v4  ;;  %v310_v0 = vmul.f32 0.7978846, %v270_v51  ;;  %v199_v4 = vmul.f32 %v159_v59, %v2103_v49  ;;  %v160_v53 = vmul.f32 %v2164_v7, %v2164_v7 }
  0x5b   :  { %1079 = vmatprep.subr.bf16.mxu0 %v1723_v9  ;;  %v2131_v9 = vunpack.c.l.bf16 %v50_v34  ;;  %v201_v54 = vmul.f32 %v161_v13, %v2125_v5 }
  0x5c   :  { %1775 = vtanh.f32 %v310_v0  ;;  %v239_v12 = vmul.f32 0.044715, %v199_v4  ;;  %v2159_v0 = vld [vmem:[#allocation2 + $0x50] sm:$0xff]  ;;  %v1739_v4 = vld [vmem:[#allocation5 + $0x200] ss:$8 sps:$4 sm:$0xff]  }
  0x5d   :  { %1007 = vmatpush1.bf16.msra.mxu1 %v1725_v18  ;;  %1777 = vtanh.f32 %v315_v3  ;;  %v2139_v18 = vunpack.c.l.bf16 %v53_v35  ;;  %v158_v21 = vmul.f32 %v2131_v9, %v2131_v9  ;;  %v241_v28 = vmul.f32 0.044715, %v201_v54 }
  0x5e   :  { %1080 = vmatpush1.bf16.msra.mxu0 %v1726_v19  ;;  %1008 = vmatprep.subr.bf16.mxu1 %v1727_v24  ;;  %v110_v19 = vmul.f32 0.5, %v2075_v2  ;;  %v279_v20 = vadd.f32 %v239_v12, %v2103_v49  ;;  %v206_v24 = vmul.f32 %v166_v17, %v2129_v8  ;;  %v1766_v2 = vpop.eup %1765  ;;  %v429_v35 = vmul.f32 %v389_v26, %v2084_v10  ;;  %v2187_v26 = vld [vmem:[#allocation2 + $0x58] sm:$0xff] }
  0x5f   :  { %1081 = vmatprep.subr.bf16.mxu0 %v1729_v25  ;;  %v163_v25 = vmul.f32 %v2139_v18, %v2139_v18  ;;  %v198_v29 = vmul.f32 %v158_v21, %v2131_v9  ;;  %v1768_v30 = vpop.eup %1767  ;;  %v394_v31 = vadd.f32 1.0, %v1766_v2  ;;  %v2169_v17 = vunpack.c.l.bf16 %v2116_v61 }
  0x60   :  { %v319_v27 = vmul.f32 0.7978846, %v279_v20  ;;  %v246_v33 = vmul.f32 0.044715, %v206_v24  ;;  %v1770_v34 = vpop.eup %1769  ;;  %v1742_v24 = vld [vmem:[#allocation5 + $0x210] ss:$8 sps:$4 sm:$0xff]  }
  0x61   :  { %1009 = vmatpush1.bf16.msra.mxu1 %v1731_v36  ;;  %v203_v6 = vmul.f32 %v163_v25, %v2139_v18  ;;  %v391_v36 = vadd.f32 1.0, %v1768_v30  ;;  %v434_v39 = vmul.f32 %v394_v31, %v2089_v14  ;;  %v396_v40 = vadd.f32 1.0, %v1770_v34 }
  0x62   :  { %1082 = vmatpush1.bf16.msra.mxu0 %v1732_v37  ;;  %1010 = vmatprep.subr.bf16.mxu1 %v1733_v42  ;;  %1779 = vtanh.f32 %v319_v27  ;;  %v281_v37 = vadd.f32 %v241_v28, %v2125_v5  ;;  %v1772_v38 = vpop.eup %1771  ;;  %v286_v41 = vadd.f32 %v246_v33, %v2129_v8  ;;  %v200_v25 = vmul.f32 %v160_v53, %v2164_v7 }
  0x63   :  { %1083 = vmatprep.subr.bf16.mxu0 %v1735_v46  ;;  %1781 = vtanh.f32 %v324_v32  ;;  %v1774_v42 = vpop.eup %1773  ;;  %v431_v43 = vmul.f32 %v391_v36, %v2111_v55  ;;  %v388_v44 = vadd.f32 1.0, %v1772_v38  ;;  %v238_v46 = vmul.f32 0.044715, %v198_v29 }
  0x64   :  { %v321_v45 = vmul.f32 0.7978846, %v281_v37  ;;  %v469_v48 = vpack.c.bf16 %v434_v39, %v429_v35  ;;  %v436_v10 = vmul.f32 %v396_v40, %v2119_v63  ;;  %v393_v50 = vadd.f32 1.0, %v1774_v42  ;;  %v1745_v40 = vld [vmem:[#allocation5 + $0x220] ss:$8 sps:$4 sm:$0xff]  }
  0x65   :  { %1011 = vmatpush1.bf16.msra.mxu1 %v1737_v62  ;;  %v326_v51 = vmul.f32 0.7978846, %v286_v41  ;;  %v428_v59 = vmul.f32 %v388_v44, %v108_v11  ;;  %v243_v14 = vmul.f32 0.044715, %v203_v6  ;;  %v2166_v11 = vld [vmem:[#allocation2 + $0x64] sm:$0xff]  ;;  %v126_v29 = vmul.f32 0.5, %v2129_v8 }
  0x66   :  { %1084 = vmatpush1.bf16.msra.mxu0 %v1738_v56  ;;  %1569 = vmatprep.subr.bf16.mxu1 %v1741_v60  ;;  %v1776_v47 = vpop.eup %1775  ;;  %1783 = vtanh.f32 %v321_v45  ;;  %v471_v1 = vpack.c.bf16 %v436_v10, %v431_v43  ;;  %v433_v56 = vmul.f32 %v393_v50, %v113_v15  ;;  %v2172_v15 = vunpack.c.h.bf16 %v2159_v0 }
  0x67   :  { %1126 = vmatprep.subr.bf16.mxu0 %v1741_v60  ;;  %v1778_v57 = vpop.eup %1777  ;;  %v390_v62 = vadd.f32 1.0, %v1776_v47  ;;  %1012 = vmatprep.mubr.bf16.mxu1 %v469_v48  ;;  %1785 = vtanh.f32 %v326_v51  ;;  %v278_v60 = vadd.f32 %v238_v46, %v2131_v9  ;;  %v283_v63 = vadd.f32 %v243_v14, %v2139_v18  ;;  %v1750_v48 = vld [vmem:[#allocation5 + $0x234] ss:$8 sps:$4 sm:$0xff]  }
  0x68   :  { %v395_v55 = vadd.f32 1.0, %v1778_v57  ;;  %1085 = vmatprep.mubr.bf16.mxu0 %v471_v1  ;;  %v468_v12 = vpack.c.bf16 %v433_v56, %v428_v59  ;;  %v2181_v61 = vunpack.c.h.bf16 %v2166_v11  ;;  %v169_v2 = vmul.f32 %v2172_v15, %v2172_v15 }
  0x69   :  { %v430_v3 = vmul.f32 %v390_v62, %v110_v19  ;;  %v119_v19 = vmul.f32 0.5, %v2103_v49  ;;  %v318_v20 = vmul.f32 0.7978846, %v278_v60  ;;  %v323_v54 = vmul.f32 0.7978846, %v283_v63 }
  0x6a   :  { %v435_v13 = vmul.f32 %v395_v55, %v115_v58  ;;  %1013 = vmatmul.mubr.bf16.vlgmr.msra.gmra.mrb[0].mxu1 %v468_v12  ;;  %v165_v58 = vmul.f32 %v2169_v17, %v2169_v17  ;;  %v121_v49 = vmul.f32 0.5, %v2125_v5  ;;  %v1747_v5 = vld [vmem:[#allocation5 + $0x224] ss:$8 sps:$4 sm:$0xff]   ;;  %v240_v32 = vmul.f32 0.044715, %v200_v25 }
  0x6b   :  { %1577 = vmatpush1.bf16.msra.mxu1 %v1739_v4  ;;  %1787 = vtanh.f32 %v318_v20  ;;  %v174_v33 = vmul.f32 %v2181_v61, %v2181_v61  ;;  %v209_v6 = vmul.f32 %v169_v2, %v2172_v15  ;;  %v2197_v36 = vunpack.c.h.bf16 %v2187_v26  ;;  %v1753_v63 = vld [vmem:[#allocation5 + $0x244] ss:$8 sps:$4 sm:$0xff]   ;;  %v1756_v2 = vld [vmem:[#allocation5 + $0x254] ss:$8 sps:$4 sm:$0xff]  }
  0x6c   :  { %v470_v21 = vpack.c.bf16 %v435_v13, %v430_v3  ;;  %v1780_v23 = vpop.eup %1779  ;;  %1570 = vmatprep.subr.bf16.mxu1 %v1744_v16  ;;  %1789 = vtanh.f32 %v323_v54  ;;  %v205_v30 = vmul.f32 %v165_v58, %v2169_v17  ;;  %v2200_v8 = vunpack.c.h.bf16 %v2189_v52 }
  0x6d   :  { %v1782_v27 = vpop.eup %1781  ;;  %v399_v28 = vadd.f32 1.0, %v1780_v23  ;;  %v280_v39 = vadd.f32 %v240_v32, %v2164_v7  ;;  %v214_v41 = vmul.f32 %v174_v33, %v2181_v61  ;;  %v249_v42 = vmul.f32 0.044715, %v209_v6  ;;  %v2240_v6 = vld [vmem:[#allocation2 + $0x8c] sm:$0xff] }
  0x6e   :  { %1086 = vmatmul.mubr.bf16.vlgmr.msra.gmra.mrb[0].mxu0 %v470_v21  ;;  %v404_v31 = vadd.f32 1.0, %v1782_v27  ;;  %v245_v35 = vmul.f32 0.044715, %v205_v30  ;;  %v118_v45 = vmul.f32 0.5, %v2131_v9  ;;  %v123_v46 = vmul.f32 0.5, %v2139_v18  ;;  %v2228_v27 = vld [vmem:[#allocation2 + $0x78] sm:$0xff] }
  0x6f   :  { %1127 = vmatpush1.bf16.msra.mxu0 %v1739_v4  ;;  %v439_v34 = vmul.f32 %v399_v28, %v119_v19  ;;  %1578 = vmatpush1.bf16.msra.mxu1 %v1742_v24  ;;  %v320_v51 = vmul.f32 0.7978846, %v280_v39  ;;  %v254_v57 = vmul.f32 0.044715, %v214_v41  ;;  %v289_v14 = vadd.f32 %v249_v42, %v2172_v15  ;;  %v1748_v18 = vld [vmem:[#allocation5 + $0x230] ss:$8 sps:$4 sm:$0xff]  }
  0x70   :  { %1128 = vmatprep.subr.bf16.mxu0 %v1744_v16  ;;  %v1784_v37 = vpop.eup %1783  ;;  %v444_v38 = vmul.f32 %v404_v31, %v124_v22  ;;  %v285_v47 = vadd.f32 %v245_v35, %v2169_v17  ;;  %1571 = vmatprep.subr.bf16.mxu1 %v1747_v5  ;;  %v171_v1 = vmul.f32 %v2197_v36, %v2197_v36  ;;  %v2215_v60 = vunpack.c.l.bf16 %v2159_v0 }
  0x71   :  { %v1786_v43 = vpop.eup %1785  ;;  %v401_v44 = vadd.f32 1.0, %v1784_v37  ;;  %1791 = vtanh.f32 %v320_v51  ;;  %v294_v56 = vadd.f32 %v254_v57, %v2181_v61  ;;  %v176_v55 = vmul.f32 %v2200_v8, %v2200_v8  ;;  %v1757_v57 = vld [vmem:[#allocation5 + $0x260] ss:$8 sps:$4 sm:$0xff]  }
  0x72   :  { %v474_v10 = vpack.c.bf16 %v444_v38, %v439_v34  ;;  %v406_v50 = vadd.f32 1.0, %v1786_v43  ;;  %v325_v62 = vmul.f32 0.7978846, %v285_v47  ;;  %v329_v3 = vmul.f32 0.7978846, %v289_v14 }
  0x73   :  { %1129 = vmatpush1.bf16.msra.mxu0 %v1742_v24  ;;  %v441_v59 = vmul.f32 %v401_v44, %v121_v49  ;;  %1579 = vmatpush1.bf16.msra.mxu1 %v1745_v40  ;;  %v211_v4 = vmul.f32 %v171_v1, %v2197_v36  ;;  %v334_v16 = vmul.f32 0.7978846, %v294_v56  ;;  %v216_v19 = vmul.f32 %v176_v55, %v2200_v8  ;;  %v1751_v24 = vld [vmem:[#allocation5 + $0x240] ss:$8 sps:$4 sm:$0xff]  }
  0x74   :  { %1130 = vmatprep.subr.bf16.mxu0 %v1747_v5  ;;  %1022 = vmatprep.mubr.bf16.mxu1 %v474_v10  ;;  %v446_v9 = vmul.f32 %v406_v50, %v126_v29  ;;  %1793 = vtanh.f32 %v325_v62  ;;  %v2219_v20 = vunpack.c.l.bf16 %v2166_v11  ;;  %v120_v21 = vmul.f32 0.5, %v2164_v7 }
  0x75   :  { %1572 = vmatprep.subr.bf16.mxu1 %v1750_v48  ;;  %v1788_v12 = vpop.eup %1787  ;;  %1795 = vtanh.f32 %v329_v3  ;;  %v251_v22 = vmul.f32 0.044715, %v211_v4  ;;  %v125_v58 = vmul.f32 0.5, %v2169_v17  ;;  %v256_v23 = vmul.f32 0.044715, %v216_v19  ;;  %v2269_v19 = vld [vmem:[#allocation2 + $0x94] sm:$0xff] }
  0x76   :  { %v476_v13 = vpack.c.bf16 %v446_v9, %v441_v59  ;;  %v1790_v54 = vpop.eup %1789  ;;  %v398_v53 = vadd.f32 1.0, %v1788_v12  ;;  %1797 = vtanh.f32 %v334_v16  ;;  %v168_v11 = vmul.f32 %v2215_v60, %v2215_v60  ;;  %v1762_v59 = vld [vmem:[#allocation5 + $0x274] ss:$8 sps:$4 sm:$0xff]   ;;  %v63_v16 = vld [vmem:[#allocation2 + $0x80] sm:$0xff] }
  0x77   :  { %1131 = vmatpush1.bf16.msra.mxu0 %v1745_v40  ;;  %v403_v0 = vadd.f32 1.0, %v1790_v54  ;;  %1580 = vmatpush1.bf16.msra.mxu1 %v1748_v18  ;;  %v291_v25 = vadd.f32 %v251_v22, %v2197_v36  ;;  %v173_v7 = vmul.f32 %v2219_v20, %v2219_v20  ;;  %v296_v17 = vadd.f32 %v256_v23, %v2200_v8  ;;  %v1759_v40 = vld [vmem:[#allocation5 + $0x264] ss:$8 sps:$4 sm:$0xff]   ;;  %v1760_v22 = vld [vmem:[#allocation5 + $0x270] ss:$8 sps:$4 sm:$0xff]  }
  0x78   :  { %1132 = vmatprep.subr.bf16.mxu0 %v1750_v48  ;;  %1095 = vmatprep.mubr.bf16.mxu0 %v476_v13  ;;  %v438_v49 = vmul.f32 %v398_v53, %v118_v45  ;;  %v2232_v29 = vunpack.c.l.bf16 %v2187_v26  ;;  %v2235_v30 = vunpack.c.l.bf16 %v2189_v52  ;;  %v129_v5 = vmul.f32 0.5, %v2172_v15  ;;  %v1754_v26 = vld [vmem:[#allocation5 + $0x250] ss:$8 sps:$4 sm:$0xff]  }
  0x79   :  { %1573 = vmatprep.subr.bf16.mxu1 %v1753_v63  ;;  %v443_v28 = vmul.f32 %v403_v0, %v123_v46  ;;  %v331_v31 = vmul.f32 0.7978846, %v291_v25  ;;  %v208_v32 = vmul.f32 %v168_v11, %v2215_v60  ;;  %v213_v33 = vmul.f32 %v173_v7, %v2219_v20 }
  0x7a   :  { %v134_v35 = vmul.f32 0.5, %v2181_v61  ;;  %v336_v37 = vmul.f32 0.7978846, %v296_v17  ;;  %v2244_v38 = vunpack.c.h.bf16 %v2228_v27  ;;  %v170_v39 = vmul.f32 %v2232_v29, %v2232_v29 }
  0x7b   :  { %1133 = vmatpush1.bf16.msra.mxu0 %v1748_v18  ;;  %v473_v34 = vpack.c.bf16 %v443_v28, %v438_v49  ;;  %1581 = vmatpush1.bf16.msra.mxu1 %v1751_v24  ;;  %1799 = vtanh.f32 %v331_v31  ;;  %v248_v52 = vmul.f32 0.044715, %v208_v32  ;;  %v253_v15 = vmul.f32 0.044715, %v213_v33  ;;  %v1792_v41 = vpop.eup %1791 }
  0x7c   :  { %1134 = vmatprep.subr.bf16.mxu0 %v1753_v63  ;;  %1574 = vmatprep.subr.bf16.mxu1 %v1756_v2  ;;  %v2249_v42 = vmul.f32 0.5, %v2197_v36  ;;  %1801 = vtanh.f32 %v336_v37  ;;  %v175_v61 = vmul.f32 %v2235_v30, %v2235_v30  ;;  %v2254_v43 = vunpack.c.h.bf16 %v2240_v6 }
  0x7d   :  { %1023 = vmatmul.mubr.bf16.gmra.mrb[4].mxu1 %v473_v34  ;;  %v400_v45 = vadd.f32 1.0, %v1792_v41  ;;  %v288_v46 = vadd.f32 %v248_v52, %v2215_v60  ;;  %v293_v47 = vadd.f32 %v253_v15, %v2219_v20  ;;  %v210_v48 = vmul.f32 %v170_v39, %v2232_v29 }
  0x7e   :  { %v1794_v44 = vpop.eup %1793  ;;  %v2260_v36 = vmul.f32 0.5, %v2200_v8  ;;  %v215_v50 = vmul.f32 %v175_v61, %v2235_v30  ;;  %v179_v51 = vmul.f32 %v2244_v38, %v2244_v38  ;;  %v184_v8 = vmul.f32 %v2254_v43, %v2254_v43 }
  0x7f   :  { %1135 = vmatpush1.bf16.msra.mxu0 %v1751_v24  ;;  %v405_v10 = vadd.f32 1.0, %v1794_v44  ;;  %1582 = vmatpush1.bf16.msra.mxu1 %v1754_v26  ;;  %v1796_v62 = vpop.eup %1795  ;;  %v440_v14 = vmul.f32 %v400_v45, %v120_v21  ;;  %v328_v1 = vmul.f32 0.7978846, %v288_v46  ;;  %v333_v9 = vmul.f32 0.7978846, %v293_v47 }
  0x80   :  { %1136 = vmatprep.subr.bf16.mxu0 %v1756_v2  ;;  %v250_v18 = vmul.f32 0.044715, %v210_v48  ;;  %1575 = vmatprep.subr.bf16.mxu1 %v1759_v40  ;;  %v1798_v56 = vpop.eup %1797  ;;  %v409_v3 = vadd.f32 1.0, %v1796_v62  ;;  %v255_v4 = vmul.f32 0.044715, %v215_v50  ;;  %v219_v13 = vmul.f32 %v179_v51, %v2244_v38 }
  0x81   :  { %v445_v55 = vmul.f32 %v405_v10, %v125_v58  ;;  %v414_v63 = vadd.f32 1.0, %v1798_v56  ;;  %1803 = vtanh.f32 %v328_v1  ;;  %v224_v23 = vmul.f32 %v184_v8, %v2254_v43 }
  0x82   :  { %v290_v12 = vadd.f32 %v250_v18, %v2232_v29  ;;  %v449_v53 = vmul.f32 %v409_v3, %v129_v5  ;;  %1805 = vtanh.f32 %v333_v9  ;;  %v295_v21 = vadd.f32 %v255_v4, %v2235_v30 }
  0x83   :  { %1137 = vmatpush1.bf16.msra.mxu0 %v1754_v26  ;;  %v475_v54 = vpack.c.bf16 %v445_v55, %v440_v14  ;;  %1583 = vmatpush1.bf16.msra.mxu1 %v1757_v57  ;;  %v454_v0 = vmul.f32 %v414_v63, %v134_v35  ;;  %v259_v24 = vmul.f32 0.044715, %v219_v13  ;;  %v128_v49 = vmul.f32 0.5, %v2215_v60 }
  0x84   :  { %1138 = vmatprep.subr.bf16.mxu0 %v1759_v40  ;;  %v330_v58 = vmul.f32 0.7978846, %v290_v12  ;;  %1576 = vmatprep.subr.bf16.mxu1 %v1762_v59  ;;  %v335_v25 = vmul.f32 0.7978846, %v295_v21  ;;  %v2274_v11 = vunpack.c.h.bf16 %v63_v16  ;;  %v2277_v7 = vunpack.c.h.bf16 %v2269_v19 }
  0x85   :  { %1096 = vmatmul.mubr.bf16.gmra.mrb[4].mxu0 %v475_v54  ;;  %v1800_v2 = vpop.eup %1799  ;;  %v479_v28 = vpack.c.bf16 %v454_v0, %v449_v53  ;;  %v264_v17 = vmul.f32 0.044715, %v224_v23  ;;  %v299_v5 = vadd.f32 %v259_v24, %v2244_v38  ;;  %v133_v33 = vmul.f32 0.5, %v2219_v20 }
  0x86   :  { %1807 = vtanh.f32 %v330_v58  ;;  %v1802_v31 = vpop.eup %1801  ;;  %v411_v32 = vadd.f32 1.0, %v1800_v2  ;;  %v2282_v60 = vunpack.c.l.bf16 %v2228_v27  ;;  %v181_v26 = vmul.f32 %v2274_v11, %v2274_v11 }
  0x87   :  { %1139 = vmatpush1.bf16.msra.mxu0 %v1757_v57  ;;  %1809 = vtanh.f32 %v335_v25  ;;  %1584 = vmatpush1.bf16.msra.mxu1 %v1760_v22  ;;  %v416_v34 = vadd.f32 1.0, %v1802_v31  ;;  %v304_v35 = vadd.f32 %v264_v17, %v2254_v43  ;;  %v339_v37 = vmul.f32 0.7978846, %v299_v5 }
  0x88   :  { %1140 = vmatprep.subr.bf16.mxu0 %v1762_v59  ;;  %1032 = vmatprep.mubr.bf16.mxu1 %v479_v28  ;;  %v451_v52 = vmul.f32 %v411_v32, %v2249_v42  ;;  %v130_v15 = vmul.f32 0.5, %v2232_v29  ;;  %v186_v20 = vmul.f32 %v2277_v7, %v2277_v7  ;;  %v2292_v27 = vunpack.c.l.bf16 %v2240_v6 }
  0x89   :  { %v456_v39 = vmul.f32 %v416_v34, %v2260_v36  ;;  %v344_v40 = vmul.f32 0.7978846, %v304_v35  ;;  %1811 = vtanh.f32 %v339_v37  ;;  %v221_v41 = vmul.f32 %v181_v26, %v2274_v11 }
  0x8a   :  { %v135_v61 = vmul.f32 0.5, %v2235_v30  ;;  %v226_v44 = vmul.f32 %v186_v20, %v2277_v7  ;;  %v178_v29 = vmul.f32 %v2282_v60, %v2282_v60  ;;  %v183_v42 = vmul.f32 %v2292_v27, %v2292_v27 }
  0x8b   :  { %1141 = vmatpush1.bf16.msra.mxu0 %v1760_v22  ;;  %v1804_v45 = vpop.eup %1803  ;;  %v481_v6 = vpack.c.bf16 %v456_v39, %v451_v52  ;;  %1813 = vtanh.f32 %v344_v40  ;;  %v261_v46 = vmul.f32 0.044715, %v221_v41  ;;  %v2302_v47 = vunpack.c.l.bf16 %v63_v16  ;;  %v58_v22 = vld [vmem:[#allocation2 + $0x60] ss:$20 sps:$4 sm:$0xff]  }
  0x8c   :  { %v1806_v48 = vpop.eup %1805  ;;  %v408_v10 = vadd.f32 1.0, %v1804_v45  ;;  %v266_v36 = vmul.f32 0.044715, %v226_v44  ;;  %v218_v50 = vmul.f32 %v178_v29, %v2282_v60  ;;  %v223_v30 = vmul.f32 %v183_v42, %v2292_v27 }
  0x8d   :  { %1105 = vmatprep.mubr.bf16.mxu0 %v481_v6  ;;  %v413_v51 = vadd.f32 1.0, %v1806_v48  ;;  %v139_v57 = vmul.f32 0.5, %v2244_v38  ;;  %v301_v59 = vadd.f32 %v261_v46, %v2274_v11  ;;  %v2309_v62 = vunpack.c.l.bf16 %v2269_v19  ;;  %v46_v19 = vld [vmem:[#allocation2 + $0x10] ss:$20 sps:$4 sm:$0xff]  }
  0x8e   :  { %v448_v14 = vmul.f32 %v408_v10, %v128_v49  ;;  %v306_v1 = vadd.f32 %v266_v36, %v2277_v7  ;;  %v258_v9 = vmul.f32 0.044715, %v218_v50  ;;  %v263_v18 = vmul.f32 0.044715, %v223_v30 }
  0x8f   :  { %v453_v55 = vmul.f32 %v413_v51, %v133_v33  ;;  %v144_v3 = vmul.f32 0.5, %v2254_v43  ;;  %v341_v4 = vmul.f32 0.7978846, %v301_v59  ;;  %v180_v8 = vmul.f32 %v2302_v47, %v2302_v47 }
  0x90   :  { %v1808_v56 = vpop.eup %1807  ;;  %v346_v12 = vmul.f32 0.7978846, %v306_v1  ;;  %v298_v13 = vadd.f32 %v258_v9, %v2282_v60  ;;  %v303_v16 = vadd.f32 %v263_v18, %v2292_v27  ;;  %v185_v21 = vmul.f32 %v2309_v62, %v2309_v62 }
  0x91   :  { %v1810_v63 = vpop.eup %1809  ;;  %v410_v38 = vadd.f32 1.0, %v1808_v56  ;;  %v478_v54 = vpack.c.bf16 %v453_v55, %v448_v14  ;;  %1815 = vtanh.f32 %v341_v4  ;;  %v220_v49 = vmul.f32 %v180_v8, %v2302_v47 }
  0x92   :  { %v415_v53 = vadd.f32 1.0, %v1810_v63  ;;  %1817 = vtanh.f32 %v346_v12  ;;  %v338_v0 = vmul.f32 0.7978846, %v298_v13  ;;  %v343_v58 = vmul.f32 0.7978846, %v303_v16 }
  0x93   :  { %v450_v43 = vmul.f32 %v410_v38, %v130_v15  ;;  %v1812_v23 = vpop.eup %1811  ;;  %1033 = vmatmul.mubr.bf16.gmra.mrb[8].mxu1 %v478_v54  ;;  %v225_v25 = vmul.f32 %v185_v21, %v2309_v62  ;;  %v2321_v2 = vunpack.c.l.bf16 %v46_v19  ;;  %v2323_v17 = vunpack.c.h.bf16 %v46_v19  ;;  %v64_v21 = vld [vmem:[#allocation2 + $0x88] ss:$20 sps:$4 sm:$0xff]  }
  0x94   :  { %v455_v24 = vmul.f32 %v415_v53, %v135_v61  ;;  %v419_v28 = vadd.f32 1.0, %v1812_v23  ;;  %1819 = vtanh.f32 %v338_v0  ;;  %v2325_v5 = vunpack.c.l.bf16 %v58_v22 }
  0x95   :  { %v1814_v31 = vpop.eup %1813  ;;  %1821 = vtanh.f32 %v343_v58  ;;  %v260_v33 = vmul.f32 0.044715, %v220_v49  ;;  %v265_v34 = vmul.f32 0.044715, %v225_v25  ;;  %v141_v26 = vmul.f32 0.5, %v2274_v11 }
  0x96   :  { %v480_v32 = vpack.c.bf16 %v455_v24, %v450_v43  ;;  %v424_v35 = vadd.f32 1.0, %v1814_v31  ;;  %v459_v37 = vmul.f32 %v419_v28, %v139_v57  ;;  %v152_v20 = vmul.f32 %v2321_v2, %v2321_v2 }
  0x97   :  { %v300_v52 = vadd.f32 %v260_v33, %v2302_v47  ;;  %v305_v15 = vadd.f32 %v265_v34, %v2309_v62  ;;  %v157_v39 = vmul.f32 %v2323_v17, %v2323_v17  ;;  %v146_v41 = vmul.f32 0.5, %v2277_v7  ;;  %v52_v7 = vld [vmem:[#allocation2 + $0x38] ss:$20 sps:$4 sm:$0xff]  }
  0x98   :  { %1106 = vmatmul.mubr.bf16.gmra.mrb[8].mxu0 %v480_v32  ;;  %v464_v40 = vmul.f32 %v424_v35, %v144_v3  ;;  %v2335_v61 = vunpack.c.h.bf16 %v58_v22  ;;  %v172_v44 = vmul.f32 %v2325_v5, %v2325_v5  ;;  %v192_v42 = vmul.f32 %v152_v20, %v2321_v2 }
  0x99   :  { %v340_v11 = vmul.f32 0.7978846, %v300_v52  ;;  %v345_v29 = vmul.f32 0.7978846, %v305_v15  ;;  %v197_v45 = vmul.f32 %v157_v39, %v2323_v17  ;;  %v138_v46 = vmul.f32 0.5, %v2282_v60 }
  0x9a   :  { %v484_v6 = vpack.c.bf16 %v464_v40, %v459_v37  ;;  %v177_v48 = vmul.f32 %v2335_v61, %v2335_v61  ;;  %v212_v10 = vmul.f32 %v172_v44, %v2325_v5  ;;  %v143_v50 = vmul.f32 0.5, %v2292_v27 }
  0x9b   :  { %v1816_v36 = vpop.eup %1815  ;;  %1823 = vtanh.f32 %v340_v11  ;;  %v232_v30 = vmul.f32 0.044715, %v192_v42  ;;  %v237_v51 = vmul.f32 0.044715, %v197_v45  ;;  %v2349_v56 = vunpack.c.l.bf16 %v52_v7 }
  0x9c   :  { %v1818_v57 = vpop.eup %1817  ;;  %1042 = vmatprep.mubr.bf16.mxu1 %v484_v6  ;;  %v421_v59 = vadd.f32 1.0, %v1816_v36  ;;  %1825 = vtanh.f32 %v345_v29  ;;  %v217_v14 = vmul.f32 %v177_v48, %v2335_v61  ;;  %v252_v1 = vmul.f32 0.044715, %v212_v10 }
  0x9d   :  { %v426_v60 = vadd.f32 1.0, %v1818_v57  ;;  %v272_v9 = vadd.f32 %v232_v30, %v2321_v2  ;;  %v277_v18 = vadd.f32 %v237_v51, %v2323_v17  ;;  %v2352_v8 = vunpack.c.h.bf16 %v52_v7 }
  0x9e   :  { %v1820_v55 = vpop.eup %1819  ;;  %v461_v3 = vmul.f32 %v421_v59, %v141_v26  ;;  %v257_v27 = vmul.f32 0.044715, %v217_v14  ;;  %v292_v4 = vadd.f32 %v252_v1, %v2325_v5  ;;  %v162_v0 = vmul.f32 %v2349_v56, %v2349_v56 }
  0x9f   :  { %v1822_v63 = vpop.eup %1821  ;;  %v466_v38 = vmul.f32 %v426_v60, %v146_v41  ;;  %v418_v12 = vadd.f32 1.0, %v1820_v55  ;;  %v312_v13 = vmul.f32 0.7978846, %v272_v9  ;;  %v317_v16 = vmul.f32 0.7978846, %v277_v18 }
  0xa0   :  { %v423_v19 = vadd.f32 1.0, %v1822_v63  ;;  %v297_v54 = vadd.f32 %v257_v27, %v2335_v61  ;;  %v332_v53 = vmul.f32 0.7978846, %v292_v4  ;;  %v167_v24 = vmul.f32 %v2352_v8, %v2352_v8 }
  0xa1   :  { %v486_v22 = vpack.c.bf16 %v466_v38, %v461_v3  ;;  %v458_v43 = vmul.f32 %v418_v12, %v138_v46  ;;  %1827 = vtanh.f32 %v312_v13  ;;  %v202_v49 = vmul.f32 %v162_v0, %v2349_v56 }
  0xa2   :  { %v463_v58 = vmul.f32 %v423_v19, %v143_v50  ;;  %1829 = vtanh.f32 %v317_v16  ;;  %v337_v23 = vmul.f32 0.7978846, %v297_v54  ;;  %v2360_v25 = vunpack.c.l.bf16 %v64_v21 }
  0xa3   :  { %1115 = vmatprep.mubr.bf16.mxu0 %v486_v22  ;;  %1831 = vtanh.f32 %v332_v53  ;;  %v2362_v28 = vunpack.c.h.bf16 %v64_v21  ;;  %v140_v32 = vmul.f32 0.5, %v2302_v47  ;;  %v207_v33 = vmul.f32 %v167_v24, %v2352_v8 }
  0xa4   :  { %v483_v31 = vpack.c.bf16 %v463_v58, %v458_v43  ;;  %1833 = vtanh.f32 %v337_v23  ;;  %v145_v35 = vmul.f32 0.5, %v2309_v62  ;;  %v242_v37 = vmul.f32 0.044715, %v202_v49 }
  0xa5   :  { %v1824_v34 = vpop.eup %1823  ;;  %v182_v26 = vmul.f32 %v2360_v25, %v2360_v25  ;;  %v247_v20 = vmul.f32 0.044715, %v207_v33  ;;  %v187_v39 = vmul.f32 %v2362_v28, %v2362_v28  ;;  %v2017_v41 = vmov 0  }
  0xa6   :  { %v1826_v52 = vpop.eup %1825  ;;  %1043 = vmatmul.mubr.bf16.gmra.mrb[12].mxu1 %v483_v31  ;;  %v420_v15 = vadd.f32 1.0, %v1824_v34  ;;  %v282_v47 = vadd.f32 %v242_v37, %v2349_v56  ;;  %v112_v46 = vmul.f32 0.5, %v2321_v2  ;;  %v117_v50 = vmul.f32 0.5, %v2323_v17 }
  0xa7   :  { %v425_v40 = vadd.f32 1.0, %v1826_v52  ;;  %1178 = vmatprep.mubr.bf16.mxu1 %v2017_v41  ;;  %v222_v44 = vmul.f32 %v182_v26, %v2360_v25  ;;  %v287_v62 = vadd.f32 %v247_v20, %v2352_v8  ;;  %v227_v29 = vmul.f32 %v187_v39, %v2362_v28 }
  0xa8   :  { %v460_v11 = vmul.f32 %v420_v15, %v140_v32  ;;  %v322_v45 = vmul.f32 0.7978846, %v282_v47  ;;  %v132_v59 = vmul.f32 0.5, %v2325_v5  ;;  %v137_v2 = vmul.f32 0.5, %v2335_v61 }
  0xa9   :  { %v465_v42 = vmul.f32 %v425_v40, %v145_v35  ;;  %v262_v6 = vmul.f32 0.044715, %v222_v44  ;;  %v327_v48 = vmul.f32 0.7978846, %v287_v62  ;;  %v267_v10 = vmul.f32 0.044715, %v227_v29 }
  0xaa   :  { %1835 = vtanh.f32 %v322_v45  ;;  %v122_v13 = vmul.f32 0.5, %v2349_v56  ;;  %v127_v61 = vmul.f32 0.5, %v2352_v8  ;;  %v142_v22 = vmul.f32 0.5, %v2360_v25  ;;  %v568_v40 = vld [vmem:[%s2554_s2] sm:$0x3]  ;;  %s2018_s2 = smov [#allocation7]  }
  0xab   :  { %v1828_v7 = vpop.eup %1827  ;;  %v485_v36 = vpack.c.bf16 %v465_v42, %v460_v11  ;;  %v302_v30 = vadd.f32 %v262_v6, %v2360_v25  ;;  %1837 = vtanh.f32 %v327_v48  ;;  %v307_v14 = vadd.f32 %v267_v10, %v2362_v28  ;;  %s1460_s13 = sshll.u32 %s2018_s2, 4  ;;  %s1461_s13 = int_to_ptr.vmem [resolvable:$true] %s1460_s13 }
  0xac   :  { %v1830_v51 = vpop.eup %1829  ;;  %v392_v57 = vadd.f32 1.0, %v1828_v7  ;;  %v147_v58 = vmul.f32 0.5, %v2362_v28  ;;  %v570_v28 = vlaneseq  ;;  %s1983_s14 = scalar_lea.vmem %s1461_s13, 2048  ;;  %p1988_p3 = scmp.lt.s32.totalorder %s1461_s13, %s1461_s13 }
  0xad   :  { %v1832_v1 = vpop.eup %1831  ;;  %1116 = vmatmul.mubr.bf16.gmra.mrb[12].mxu0 %v485_v36  ;;  %v397_v60 = vadd.f32 1.0, %v1830_v51  ;;  %v342_v9 = vmul.f32 0.7978846, %v302_v30  ;;  %v347_v3 = vmul.f32 0.7978846, %v307_v14  ;;  %p1984_p2 = scmp.ne.s32.totalorder %s1461_s13, %s1983_s14  ;;  %p1989_p4 = scmp.lt.s32.totalorder %s1983_s14, %s1983_s14 }
  0xae   :  { %v1834_v18 = vpop.eup %1833  ;;  %1158 = vmatprep.mubr.bf16.mxu0 %v2017_v41  ;;  %v432_v55 = vmul.f32 %v392_v57, %v112_v46  ;;  %v412_v17 = vadd.f32 1.0, %v1832_v1  ;;  %v571_v20 = vshrl.u32 %v570_v28, 7 }
  0xaf   :  { %v437_v27 = vmul.f32 %v397_v60, %v117_v50  ;;  %v417_v4 = vadd.f32 1.0, %v1834_v18  ;;  %1839 = vtanh.f32 %v342_v9  ;;  %p1990_p5 = por %p1989_p4, %p1988_p3 }
  0xb0   :  { %v452_v63 = vmul.f32 %v412_v17, %v132_v59  ;;  %1841 = vtanh.f32 %v347_v3  ;;  %v572_v39 = vsub.s32 0, %v571_v20 }
  0xb1   :  { %v472_v5 = vpack.c.bf16 %v437_v27, %v432_v55  ;;  %v457_v38 = vmul.f32 %v417_v4, %v137_v2  ;;  %p1991_p6 = pnand %p1990_p5, %p1984_p2 }
  0xb2   :  { %v2394_v47 = vrot.slane %v568_v40, %v572_v39 }
  0xb3   :  { %v482_v12 = vpack.c.bf16 %v457_v38, %v452_v63 }
  0xb4   :  { %v1836_v16 = vpop.eup %1835 }
  0xb5   :  { %1159 = vmatmul.mubr.bf16.vlgmr.msra.gmra.mrb[0].mxu0 %v472_v5  ;;  %1179 = vmatmul.mubr.bf16.vlgmr.msra.gmra.mrb[16].mxu1 %v482_v12  ;;  %v1838_v19 = vpop.eup %1837  ;;  %v402_v54 = vadd.f32 1.0, %v1836_v16 }
  0xb6   :  { %1168 = vmatprep.mubr.bf16.mxu0 %v2017_v41  ;;  %1188 = vmatprep.mubr.bf16.mxu1 %v2017_v41  ;;  %v407_v53 = vadd.f32 1.0, %v1838_v19  ;;  %v576_v41 = vsub.s32 1, %v571_v20 }
  0xb7   :  { %v442_v21 = vmul.f32 %v402_v54, %v122_v13 }
  0xb8   :  { %v447_v0 = vmul.f32 %v407_v53, %v127_v61  ;;  %v2396_v44 = vrot.slane %v568_v40, %v576_v41 }
  0xb9   :  { %v1840_v43 = vpop.eup %1839 }
  0xba   :  { %v1842_v23 = vpop.eup %1841  ;;  %v422_v24 = vadd.f32 1.0, %v1840_v43  ;;  %v477_v56 = vpack.c.bf16 %v447_v0, %v442_v21 }
  0xbb   :  { %v427_v49 = vadd.f32 1.0, %v1842_v23 }
  0xbc   :  { %v462_v31 = vmul.f32 %v422_v24, %v142_v22 }
  0xbd   :  { %1169 = vmatmul.mubr.bf16.gmra.mrb[4].mxu0 %v477_v56  ;;  %v467_v32 = vmul.f32 %v427_v49, %v147_v58 }
  0xbf   :  { %v487_v8 = vpack.c.bf16 %v467_v32, %v462_v31 }
  0xc1   :  { %1189 = vmatmul.mubr.bf16.gmra.mrb[20].mxu1 %v487_v8 }
 0x13d   :  { %v1014_v33 = vpop.f32.mrb[0].mxu1 }
 0x13e   :  { %v1016_v34 = vpop.f32.mrb[1].mxu1  ;;  %v1015_v16 = vadd.f32 %v1014_v33, %v2394_v47 }
 0x13f   :  { %v1018_v35 = vpop.f32.mrb[2].mxu1  ;;  %v1017_v61 = vadd.f32 %v1016_v34, %v2396_v44 }
 0x140   :  { %v1020_v37 = vpop.f32.mrb[3].mxu1  ;;  %v1019_v56 = vadd.f32 %v1018_v35, %v2394_v47 }
 0x141   :  { %v1021_v33 = vadd.f32 %v1020_v37, %v2396_v44 }
 0x150   :  { %v1024_v26 = vpop.f32.mrb[4].mxu1 }
 0x151   :  { %v2385_v52 = vpop.f32.mrb[5].mxu1  ;;  %v1025_v34 = vadd.f32 %v1024_v26, %v2394_v47 }
 0x152   :  { %v2387_v25 = vpop.f32.mrb[6].mxu1 }
 0x153   :  { %v2389_v15 = vpop.f32.mrb[7].mxu1 }
 0x166   :  { %v1034_v11 = vpop.f32.mrb[8].mxu1 }
 0x167   :  { %v1035_v62 = vadd.f32 %v1034_v11, %v2394_v47  ;;  %v1036_v29 = vpop.f32.mrb[9].mxu1 }
 0x168   :  { %v1037_v42 = vadd.f32 %v1036_v29, %v2396_v44  ;;  %v1038_v45 = vpop.f32.mrb[10].mxu1  ;;  %v1027_v29 = vadd.f32 %v2385_v52, %v2396_v44 }
 0x169   :  { %v1039_v6 = vadd.f32 %v1038_v45, %v2394_v47  ;;  %v1040_v46 = vpop.f32.mrb[11].mxu1 }
 0x16a   :  { %v1041_v10 = vadd.f32 %v1040_v46, %v2396_v44  ;;  %v1029_v46 = vadd.f32 %v2387_v25, %v2394_v47 }
 0x16b   :  { %v1107_v48 = vpop.f32.mrb[8].mxu0 }
 0x16c   :  { %v1108_v7 = vadd.f32 %v1107_v48, %v1035_v62  ;;  %v1109_v36 = vpop.f32.mrb[9].mxu0 }
 0x16d   :  { %v1110_v50 = vadd.f32 %v1109_v36, %v1037_v42  ;;  %v1111_v30 = vpop.f32.mrb[10].mxu0 }
 0x16e   :  { %v1112_v51 = vadd.f32 %v1111_v30, %v1039_v6  ;;  %v1113_v57 = vpop.f32.mrb[11].mxu0 }
 0x16f   :  { %v1114_v59 = vadd.f32 %v1113_v57, %v1041_v10 }
 0x179   :  { %v1044_v14 = vpop.f32.mrb[12].mxu1 }
 0x17a   :  { %v1046_v1 = vpop.f32.mrb[13].mxu1  ;;  %v1045_v9 = vadd.f32 %v1044_v14, %v2394_v47 }
 0x17b   :  { %v1048_v60 = vpop.f32.mrb[14].mxu1  ;;  %v1047_v18 = vadd.f32 %v1046_v1, %v2396_v44 }
 0x17c   :  { %v1050_v2 = vpop.f32.mrb[15].mxu1  ;;  %v1049_v55 = vadd.f32 %v1048_v60, %v2394_v47 }
 0x17d   :  { %v1051_v3 = vadd.f32 %v1050_v2, %v2396_v44 }
 0x180   :  { %v1117_v17 = vpop.f32.mrb[12].mxu0 }
 0x181   :  { %v2406_v27 = vadd.f32 %v1117_v17, %v1045_v9  ;;  %v1119_v4 = vpop.f32.mrb[13].mxu0 }
 0x182   :  { %v2408_v63 = vadd.f32 %v1119_v4, %v1047_v18  ;;  %v1121_v5 = vpop.f32.mrb[14].mxu0 }
 0x183   :  { %v2410_v38 = vadd.f32 %v1121_v5, %v1049_v55  ;;  %v1123_v12 = vpop.f32.mrb[15].mxu0 }
 0x184   :  { %v2412_v13 = vadd.f32 %v1123_v12, %v1051_v3 }
 0x188   :  { %v1160_v19 = vpop.f32.mrb[0].mxu0  ;;  %v1180_v54 = vpop.f32.mrb[16].mxu1 }
 0x189   :  { %v1586_v53 = vadd.f32 %v1160_v19, %v1015_v16  ;;  %v2416_v21 = vadd.f32 %v1180_v54, %v1108_v7  ;;  %v1162_v22 = vpop.f32.mrb[1].mxu0  ;;  %v1182_v43 = vpop.f32.mrb[17].mxu1 }
 0x18a   :  { %v2418_v0 = vadd.f32 %v1162_v22, %v1017_v61  ;;  %v2420_v58 = vadd.f32 %v1182_v43, %v1110_v50  ;;  %v1164_v23 = vpop.f32.mrb[2].mxu0  ;;  %v1184_v24 = vpop.f32.mrb[18].mxu1  ;;  %v2452_v50 = vadd.f32 %v2389_v15, %v2396_v44 }
 0x18b   :  { %v1215_v49 = vmul.f32 %v1586_v53, %v1586_v53  ;;  %v1223_v31 = vmul.f32 %v2416_v21, %v2416_v21  ;;  %v1166_v32 = vpop.f32.mrb[3].mxu0  ;;  %v1186_v8 = vpop.f32.mrb[19].mxu1  ;;  %v2432_v35 = vadd.f32 %v1164_v23, %v1019_v56  ;;  %v2434_v41 = vadd.f32 %v1184_v24, %v1112_v51 }
 0x18c   :  { %v1216_v28 = vmul.f32 %v2418_v0, %v2418_v0  ;;  %v1224_v20 = vmul.f32 %v2420_v58, %v2420_v58  ;;  %v2438_v37 = vadd.f32 %v1166_v32, %v1021_v33  ;;  %v2440_v26 = vadd.f32 %v1186_v8, %v1114_v59 }
 0x18d   :  { %v1231_v39 = vmul.f32 %v1586_v53, %v1215_v49  ;;  %v1239_v40 = vmul.f32 %v1223_v31, %v2416_v21  ;;  %v1217_v6 = vmul.f32 %v2432_v35, %v2432_v35  ;;  %v1225_v7 = vmul.f32 %v2434_v41, %v2434_v41 }
 0x18e   :  { %v1232_v11 = vmul.f32 %v2418_v0, %v1216_v28  ;;  %v1240_v62 = vmul.f32 %v1224_v20, %v2420_v58  ;;  %v1218_v14 = vmul.f32 %v2438_v37, %v2438_v37  ;;  %v1226_v44 = vmul.f32 %v2440_v26, %v2440_v26 }
 0x18f   :  { %v1247_v42 = vmul.f32 0.044715, %v1231_v39  ;;  %v1255_v45 = vmul.f32 0.044715, %v1239_v40  ;;  %v1233_v51 = vmul.f32 %v2432_v35, %v1217_v6  ;;  %v1241_v47 = vmul.f32 %v1225_v7, %v2434_v41 }
 0x190   :  { %v1248_v48 = vmul.f32 0.044715, %v1232_v11  ;;  %v1256_v10 = vmul.f32 0.044715, %v1240_v62  ;;  %v1170_v36 = vpop.f32.mrb[4].mxu0  ;;  %v1234_v17 = vmul.f32 %v2438_v37, %v1218_v14  ;;  %v1199_v3 = vmul.f32 0.5, %v1586_v53 }
 0x191   :  { %v1263_v30 = vadd.f32 %v1586_v53, %v1247_v42  ;;  %v1271_v52 = vadd.f32 %v1255_v45, %v2416_v21  ;;  %v1172_v57 = vpop.f32.mrb[5].mxu0  ;;  %v1249_v15 = vmul.f32 0.044715, %v1233_v51  ;;  %v1257_v55 = vmul.f32 0.044715, %v1241_v47 }
 0x192   :  { %v1264_v59 = vadd.f32 %v2418_v0, %v1248_v48  ;;  %v1272_v25 = vadd.f32 %v1256_v10, %v2420_v58  ;;  %v1174_v1 = vpop.f32.mrb[6].mxu0  ;;  %v1242_v5 = vmul.f32 %v1226_v44, %v2440_v26  ;;  %v1250_v19 = vmul.f32 0.044715, %v1234_v17 }
 0x193   :  { %v1279_v60 = vmul.f32 0.7978846, %v1263_v30  ;;  %v1287_v2 = vmul.f32 0.7978846, %v1271_v52  ;;  %v1265_v4 = vadd.f32 %v2432_v35, %v1249_v15  ;;  %v1176_v16 = vpop.f32.mrb[7].mxu0  ;;  %v1273_v61 = vadd.f32 %v1257_v55, %v2434_v41 }
 0x194   :  { %v1280_v9 = vmul.f32 0.7978846, %v1264_v59  ;;  %v1288_v18 = vmul.f32 0.7978846, %v1272_v25  ;;  %v1190_v12 = vpop.f32.mrb[20].mxu1  ;;  %v2467_v54 = vadd.f32 %v1170_v36, %v1025_v34  ;;  %v1207_v56 = vmul.f32 0.5, %v2416_v21 }
 0x195   :  { %1843 = vtanh.f32 %v1279_v60  ;;  %v1192_v22 = vpop.f32.mrb[21].mxu1  ;;  %v1281_v43 = vmul.f32 0.7978846, %v1265_v4  ;;  %v1258_v23 = vmul.f32 0.044715, %v1242_v5  ;;  %v2470_v24 = vadd.f32 %v1190_v12, %v2406_v27 }
 0x196   :  { %1845 = vtanh.f32 %v1287_v2  ;;  %v1194_v53 = vpop.f32.mrb[22].mxu1  ;;  %v1289_v49 = vmul.f32 0.7978846, %v1273_v61  ;;  %v1266_v31 = vadd.f32 %v2438_v37, %v1250_v19  ;;  %v1200_v8 = vmul.f32 0.5, %v2418_v0 }
 0x197   :  { %1847 = vtanh.f32 %v1280_v9  ;;  %v2474_v32 = vpop.f32.mrb[23].mxu1  ;;  %v1274_v33 = vadd.f32 %v1258_v23, %v2440_v26  ;;  %v1219_v34 = vmul.f32 %v2467_v54, %v2467_v54  ;;  %v1227_v28 = vmul.f32 %v2470_v24, %v2470_v24 }
 0x198   :  { %1849 = vtanh.f32 %v1288_v18  ;;  %v1282_v27 = vmul.f32 0.7978846, %v1266_v31  ;;  %v2482_v21 = vadd.f32 %v1172_v57, %v1027_v29  ;;  %v2486_v40 = vadd.f32 %v1192_v22, %v2408_v63 }
 0x199   :  { %1851 = vtanh.f32 %v1281_v43  ;;  %v1290_v20 = vmul.f32 0.7978846, %v1274_v33  ;;  %v1235_v39 = vmul.f32 %v2467_v54, %v1219_v34  ;;  %v2488_v0 = vadd.f32 %v1174_v1, %v1029_v46 }
 0x19a   :  { %1853 = vtanh.f32 %v1289_v49  ;;  %v1208_v11 = vmul.f32 0.5, %v2420_v58  ;;  %v1243_v62 = vmul.f32 %v1227_v28, %v2470_v24  ;;  %v1220_v42 = vmul.f32 %v2482_v21, %v2482_v21 }
 0x19b   :  { %1855 = vtanh.f32 %v1282_v27  ;;  %v1201_v45 = vmul.f32 0.5, %v2432_v35  ;;  %v1251_v29 = vmul.f32 0.044715, %v1235_v39  ;;  %v1228_v6 = vmul.f32 %v2486_v40, %v2486_v40 }
 0x19c   :  { %1857 = vtanh.f32 %v1290_v20  ;;  %v1209_v63 = vmul.f32 0.5, %v2434_v41  ;;  %v1259_v48 = vmul.f32 0.044715, %v1243_v62  ;;  %v1236_v46 = vmul.f32 %v2482_v21, %v1220_v42 }
 0x19d   :  { %v1221_v58 = vmul.f32 %v2488_v0, %v2488_v0  ;;  %v1267_v7 = vadd.f32 %v2467_v54, %v1251_v29  ;;  %v1244_v36 = vmul.f32 %v1228_v6, %v2486_v40  ;;  %v2504_v35 = vadd.f32 %v1194_v53, %v2410_v38 }
 0x19e   :  { %v2507_v30 = vadd.f32 %v1176_v16, %v2452_v50  ;;  %v1202_v41 = vmul.f32 0.5, %v2438_v37  ;;  %v1275_v57 = vadd.f32 %v1259_v48, %v2470_v24  ;;  %v1252_v59 = vmul.f32 0.044715, %v1236_v46 }
 0x19f   :  { %v1844_v10 = vpop.eup %1843  ;;  %v1210_v14 = vmul.f32 0.5, %v2440_v26  ;;  %v1283_v1 = vmul.f32 0.7978846, %v1267_v7  ;;  %v1260_v60 = vmul.f32 0.044715, %v1244_v36  ;;  %v1237_v37 = vmul.f32 %v2488_v0, %v1221_v58 }
 0x1a0   :  { %v1846_v52 = vpop.eup %1845  ;;  %v1311_v51 = vadd.f32 1.0, %v1844_v10  ;;  %v1291_v44 = vmul.f32 0.7978846, %v1275_v57  ;;  %v1268_v50 = vadd.f32 %v2482_v21, %v1252_v59  ;;  %v1203_v36 = vmul.f32 0.5, %v2467_v54 }
 0x1a1   :  { %v1848_v25 = vpop.eup %1847  ;;  %v1319_v47 = vadd.f32 1.0, %v1846_v52  ;;  %1859 = vtanh.f32 %v1283_v1  ;;  %v1253_v34 = vmul.f32 0.044715, %v1237_v37 }
 0x1a2   :  { %v1850_v2 = vpop.eup %1849  ;;  %v1327_v15 = vmul.f32 %v1311_v51, %v1199_v3  ;;  %v1312_v38 = vadd.f32 1.0, %v1848_v25  ;;  %1861 = vtanh.f32 %v1291_v44  ;;  %v1276_v3 = vadd.f32 %v1260_v60, %v2486_v40 }
 0x1a3   :  { %v1852_v9 = vpop.eup %1851  ;;  %v1335_v18 = vmul.f32 %v1319_v47, %v1207_v56  ;;  %v1320_v55 = vadd.f32 1.0, %v1850_v2  ;;  %v1284_v23 = vmul.f32 0.7978846, %v1268_v50  ;;  %v1269_v39 = vadd.f32 %v2488_v0, %v1253_v34 }
 0x1a4   :  { %v1854_v17 = vpop.eup %1853  ;;  %v1553_v4 = vmul.f32 -1.442695, %v1327_v15  ;;  %v1328_v5 = vmul.f32 %v1312_v38, %v1200_v8  ;;  %v1313_v12 = vadd.f32 1.0, %v1852_v9  ;;  %v1292_v42 = vmul.f32 0.7978846, %v1276_v3 }
 0x1a5   :  { %v1561_v26 = vmul.f32 -1.442695, %v1335_v18  ;;  %v1336_v16 = vmul.f32 %v1320_v55, %v1208_v11  ;;  %v1321_v61 = vadd.f32 1.0, %v1854_v17  ;;  %v1856_v19 = vpop.eup %1855  ;;  %v1229_v11 = vmul.f32 %v2504_v35, %v2504_v35 }
 0x1a6   :  { %1863 = vpow2.f32 %v1553_v4  ;;  %v1554_v22 = vmul.f32 -1.442695, %v1328_v5  ;;  %v1329_v43 = vmul.f32 %v1313_v12, %v1201_v45  ;;  %v1858_v53 = vpop.eup %1857  ;;  %v1314_v31 = vadd.f32 1.0, %v1856_v19 }
 0x1a7   :  { %1865 = vpow2.f32 %v1561_v26  ;;  %v1562_v56 = vmul.f32 -1.442695, %v1336_v16  ;;  %v1337_v49 = vmul.f32 %v1321_v61, %v1209_v63  ;;  %v1322_v8 = vadd.f32 1.0, %v1858_v53 }
 0x1a8   :  { %1867 = vpow2.f32 %v1554_v22  ;;  %v1555_v33 = vmul.f32 -1.442695, %v1329_v43  ;;  %v1330_v28 = vmul.f32 %v1314_v31, %v1202_v41  ;;  %v1222_v45 = vmul.f32 %v2507_v30, %v2507_v30 }
 0x1a9   :  { %1869 = vpow2.f32 %v1562_v56  ;;  %v1563_v27 = vmul.f32 -1.442695, %v1337_v49  ;;  %v1338_v20 = vmul.f32 %v1322_v8, %v1210_v14  ;;  %v1285_v6 = vmul.f32 0.7978846, %v1269_v39 }
 0x1aa   :  { %1871 = vpow2.f32 %v1555_v33  ;;  %v1556_v62 = vmul.f32 -1.442695, %v1330_v28  ;;  %v2522_v63 = vadd.f32 %v2474_v32, %v2412_v13  ;;  %v1245_v10 = vmul.f32 %v1229_v11, %v2504_v35 }
 0x1ab   :  { %1873 = vpow2.f32 %v1563_v27  ;;  %v1564_v29 = vmul.f32 -1.442695, %v1338_v20  ;;  %v1860_v48 = vpop.eup %1859  ;;  %v1238_v52 = vmul.f32 %v2507_v30, %v1222_v45  ;;  %v1211_v47 = vmul.f32 0.5, %v2470_v24 }
 0x1ac   :  { %1875 = vtanh.f32 %v1284_v23  ;;  %v1862_v46 = vpop.eup %1861  ;;  %v1315_v58 = vadd.f32 1.0, %v1860_v48  ;;  %v1230_v7 = vmul.f32 %v2522_v63, %v2522_v63  ;;  %v1261_v14 = vmul.f32 0.044715, %v1245_v10 }
 0x1ad   :  { %1877 = vpow2.f32 %v1556_v62  ;;  %v1323_v41 = vadd.f32 1.0, %v1862_v46  ;;  %v1254_v54 = vmul.f32 0.044715, %v1238_v52  ;;  %v1204_v5 = vmul.f32 0.5, %v2482_v21 }
 0x1ae   :  { %1879 = vpow2.f32 %v1564_v29  ;;  %v1331_v57 = vmul.f32 %v1315_v58, %v1203_v36  ;;  %v1246_v1 = vmul.f32 %v1230_v7, %v2522_v63  ;;  %v1277_v24 = vadd.f32 %v1261_v14, %v2504_v35 }
 0x1af   :  { %1881 = vtanh.f32 %v1292_v42  ;;  %v1339_v44 = vmul.f32 %v1323_v41, %v1211_v47  ;;  %v1270_v26 = vadd.f32 %v2507_v30, %v1254_v54  ;;  %v1212_v19 = vmul.f32 0.5, %v2486_v40 }
 0x1b0   :  { %v1864_v51 = vpop.eup %1863  ;;  %1883 = vtanh.f32 %v1285_v6  ;;  %v1557_v18 = vmul.f32 -1.442695, %v1331_v57  ;;  %v1262_v17 = vmul.f32 0.044715, %v1246_v1  ;;  %v1205_v53 = vmul.f32 0.5, %v2488_v0 }
 0x1b1   :  { %v1866_v13 = vpop.eup %1865  ;;  %v1391_v32 = vadd.f32 1.0, %v1864_v51  ;;  %v1565_v3 = vmul.f32 -1.442695, %v1339_v44  ;;  %v1293_v31 = vmul.f32 0.7978846, %v1277_v24 }
 0x1b2   :  { %v1868_v59 = vpop.eup %1867  ;;  %v1399_v25 = vadd.f32 1.0, %v1866_v13  ;;  %v1278_v21 = vadd.f32 %v1262_v17, %v2522_v63  ;;  %v1286_v34 = vmul.f32 0.7978846, %v1270_v26  ;;  %v1213_v13 = vmul.f32 0.5, %v2504_v35 }
 0x1b3   :  { %v1870_v60 = vpop.eup %1869  ;;  %1885 = vrcp.f32 %v1391_v32  ;;  %v1392_v2 = vadd.f32 1.0, %v1868_v59  ;;  %v1206_v59 = vmul.f32 0.5, %v2507_v30 }
 0x1b4   :  { %v1872_v15 = vpop.eup %1871  ;;  %1887 = vrcp.f32 %v1399_v25  ;;  %v1400_v38 = vadd.f32 1.0, %v1870_v60  ;;  %v1294_v0 = vmul.f32 0.7978846, %v1278_v21 }
 0x1b5   :  { %v1874_v50 = vpop.eup %1873  ;;  %1889 = vrcp.f32 %v1392_v2  ;;  %v1393_v9 = vadd.f32 1.0, %v1872_v15 }
 0x1b6   :  { %v1876_v55 = vpop.eup %1875  ;;  %1891 = vrcp.f32 %v1400_v38  ;;  %v1401_v37 = vadd.f32 1.0, %v1874_v50  ;;  %v1214_v38 = vmul.f32 0.5, %v2522_v63 }
 0x1b7   :  { %v1878_v4 = vpop.eup %1877  ;;  %1893 = vrcp.f32 %v1393_v9  ;;  %v1316_v12 = vadd.f32 1.0, %v1876_v55 }
 0x1b8   :  { %v1880_v16 = vpop.eup %1879  ;;  %1895 = vrcp.f32 %v1401_v37  ;;  %v1394_v61 = vadd.f32 1.0, %v1878_v4 }
 0x1b9   :  { %v1882_v22 = vpop.eup %1881  ;;  %v1402_v43 = vadd.f32 1.0, %v1880_v16  ;;  %1897 = vpow2.f32 %v1557_v18  ;;  %v1332_v23 = vmul.f32 %v1316_v12, %v1204_v5 }
 0x1ba   :  { %v1884_v56 = vpop.eup %1883  ;;  %1899 = vrcp.f32 %v1394_v61  ;;  %v1324_v49 = vadd.f32 1.0, %v1882_v22 }
 0x1bb   :  { %1901 = vrcp.f32 %v1402_v43  ;;  %v1558_v33 = vmul.f32 -1.442695, %v1332_v23  ;;  %v1317_v8 = vadd.f32 1.0, %v1884_v56 }
 0x1bc   :  { %1903 = vpow2.f32 %v1565_v3  ;;  %v1340_v27 = vmul.f32 %v1324_v49, %v1212_v19 }
 0x1bd   :  { %v1886_v28 = vpop.eup %1885  ;;  %1905 = vpow2.f32 %v1558_v33  ;;  %v1333_v40 = vmul.f32 %v1317_v8, %v1205_v53 }
 0x1be   :  { %v1888_v20 = vpop.eup %1887  ;;  %1439 = vst [vmem:[#allocation7] sm:$0xff] %v1886_v28  ;;  %v1566_v39 = vmul.f32 -1.442695, %v1340_v27  ;;  %1907 = vtanh.f32 %v1293_v31 }
 0x1bf   :  { %v1890_v11 = vpop.eup %1889  ;;  %1447 = vst [vmem:[#allocation7 + $0x40] sm:$0xff] %v1888_v20  ;;  %v1559_v62 = vmul.f32 -1.442695, %v1333_v40  ;;  %1909 = vtanh.f32 %v1286_v34 }
 0x1c0   :  { %v1892_v42 = vpop.eup %1891  ;;  %1440 = vst [vmem:[#allocation7 + $0x8] sm:$0xff] %v1890_v11  ;;  %1911 = vpow2.f32 %v1566_v39 }
 0x1c1   :  { %v1894_v45 = vpop.eup %1893  ;;  %1448 = vst [vmem:[#allocation7 + $0x48] sm:$0xff] %v1892_v42  ;;  %1913 = vpow2.f32 %v1559_v62 }
 0x1c2   :  { %v1896_v29 = vpop.eup %1895  ;;  %1441 = vst [vmem:[#allocation7 + $0x10] sm:$0xff] %v1894_v45  ;;  %1915 = vtanh.f32 %v1294_v0 }
 0x1c3   :  { %v1898_v6 = vpop.eup %1897  ;;  %1449 = vst [vmem:[#allocation7 + $0x50] sm:$0xff] %v1896_v29 }
 0x1c4   :  { %v1900_v48 = vpop.eup %1899  ;;  %v1395_v46 = vadd.f32 1.0, %v1898_v6 }
 0x1c5   :  { %v1902_v58 = vpop.eup %1901  ;;  %1442 = vst [vmem:[#allocation7 + $0x18] sm:$0xff] %v1900_v48 }
 0x1c6   :  { %v1904_v10 = vpop.eup %1903  ;;  %1450 = vst [vmem:[#allocation7 + $0x58] sm:$0xff] %v1902_v58  ;;  %1917 = vrcp.f32 %v1395_v46 }
 0x1c7   :  { %v1906_v7 = vpop.eup %1905  ;;  %v1403_v36 = vadd.f32 1.0, %v1904_v10 }
 0x1c8   :  { %v1908_v52 = vpop.eup %1907  ;;  %v1396_v51 = vadd.f32 1.0, %v1906_v7 }
 0x1c9   :  { %v1910_v41 = vpop.eup %1909  ;;  %1919 = vrcp.f32 %v1403_v36  ;;  %v1325_v32 = vadd.f32 1.0, %v1908_v52 }
 0x1ca   :  { %v1912_v57 = vpop.eup %1911  ;;  %1921 = vrcp.f32 %v1396_v51  ;;  %v1318_v25 = vadd.f32 1.0, %v1910_v41 }
 0x1cb   :  { %v1914_v47 = vpop.eup %1913  ;;  %v1404_v14 = vadd.f32 1.0, %v1912_v57  ;;  %v1341_v1 = vmul.f32 %v1325_v32, %v1213_v13 }
 0x1cc   :  { %v1916_v60 = vpop.eup %1915  ;;  %v1397_v2 = vadd.f32 1.0, %v1914_v47  ;;  %v1334_v54 = vmul.f32 %v1318_v25, %v1206_v59 }
 0x1cd   :  { %1923 = vrcp.f32 %v1404_v14  ;;  %v1567_v15 = vmul.f32 -1.442695, %v1341_v1  ;;  %v1326_v44 = vadd.f32 1.0, %v1916_v60 }
 0x1ce   :  { %1925 = vrcp.f32 %v1397_v2  ;;  %v1560_v50 = vmul.f32 -1.442695, %v1334_v54 }
 0x1cf   :  { %1927 = vpow2.f32 %v1567_v15  ;;  %v1342_v35 = vmul.f32 %v1326_v44, %v1214_v38 }
 0x1d0   :  { %v1918_v9 = vpop.eup %1917  ;;  %1929 = vpow2.f32 %v1560_v50 }
 0x1d1   :  { %1443 = vst [vmem:[#allocation7 + $0x20] sm:$0xff] %v1918_v9  ;;  %v1568_v30 = vmul.f32 -1.442695, %v1342_v35 }
 0x1d3   :  { %v1920_v18 = vpop.eup %1919  ;;  %1931 = vpow2.f32 %v1568_v30 }
 0x1d4   :  { %v1922_v55 = vpop.eup %1921  ;;  %1451 = vst [vmem:[#allocation7 + $0x60] sm:$0xff] %v1920_v18 }
 0x1d5   :  { %1444 = vst [vmem:[#allocation7 + $0x28] sm:$0xff] %v1922_v55 }
 0x1d7   :  { %v1924_v37 = vpop.eup %1923 }
 0x1d8   :  { %v1926_v24 = vpop.eup %1925  ;;  %1452 = vst [vmem:[#allocation7 + $0x68] sm:$0xff] %v1924_v37 }
 0x1d9   :  { %v1928_v17 = vpop.eup %1927  ;;  %1445 = vst [vmem:[#allocation7 + $0x30] sm:$0xff] %v1926_v24 }
 0x1da   :  { %v1930_v63 = vpop.eup %1929  ;;  %v1405_v4 = vadd.f32 1.0, %v1928_v17 }
 0x1db   :  { %v1398_v5 = vadd.f32 1.0, %v1930_v63 }
 0x1dc   :  { %1933 = vrcp.f32 %v1405_v4 }
 0x1dd   :  { %v1932_v12 = vpop.eup %1931  ;;  %1935 = vrcp.f32 %v1398_v5 }
 0x1de   :  { %v1406_v26 = vadd.f32 1.0, %v1932_v12 }
 0x1e0   :  { %1937 = vrcp.f32 %v1406_v26 }
 0x1e6   :  { %v1934_v16 = vpop.eup %1933 }
 0x1e7   :  { %v1936_v61 = vpop.eup %1935  ;;  %1453 = vst [vmem:[#allocation7 + $0x70] sm:$0xff] %v1934_v16 }
 0x1e8   :  { %1446 = vst [vmem:[#allocation7 + $0x38] sm:$0xff] %v1936_v61 }
 0x1ea   :  { %v1938_v3 = vpop.eup %1937 }
 0x1eb   :  { %1454 = vst [vmem:[#allocation7 + $0x78] sm:$0xff] %v1938_v3 }
 0x1ec   :  { %1994 = shalt.err (!%p1991_p6)
}
 0x1ed   :  { %s1995_s17 = scalar_lea.hbm %s2555_s3, 2048 }
 0x1ee   :  { %p1996_p7 = scmp.ne.s32.totalorder %s2555_s3, %s1995_s17  ;;  %p1999_p8 = scmp.lt.u32.totalorder %s1995_s17, %s2555_s3 }
 0x1f0   :  { %p2001_p9 = pnand %p1999_p8, %p1996_p7 }
 0x1f2   :  { %2004 = shalt.err (!%p2001_p9)
}
 0x1f3   :  { %s2019_s22 = smov 256   ;;  %s2020_s23 = smov 16  }
 0x1f4   :  { %1466 = dma.vmem_to_hbm [thread:$0]  %s1461_s13, 2048, %s2555_s3, [#allocation4], %s2019_s22, %s2019_s22, %s2020_s23  }
 0x1f5   :  { %2009 = dma.done.wait [#allocation4], 2048  }
 0x1f6   :  { %2010 = vsyncadd [#allocation4], 4294965248 }
 0x1f7   :  { %1470 = vsyncpa [#allocation3], 1 }
 0x1f8   :  { %1471 = vsyncpa [#allocation6], 1 }
 0x1f9   :  { %1472 = vsyncpa [#allocation4], 1 }

</bundles_post_ra>
